<compile_context>
chip_gen: v7x
topology: tpu7x:2x2x1
jax: 0.10.0
libtpu: 0.0.40
codegen_flags: <defaults>
</compile_context>

<pallas_src>
import functools

import jax
import jax.numpy as jnp
from jax.experimental import pallas as pl
from jax.experimental.pallas import tpu as pltpu

LANES = 128              # lane-dense padding for every last dim fed to the kernel
CHUNK = 128              # patch rows processed per unrolled inner-loop step
K = 3                    # conv kernel size
C_IN = 3                 # RGB
KTAPS = K * K * C_IN     # 27 real im2col lanes
BIAS_ROW = KTAPS         # lane 27 of every patch row is a constant 1.0 (bias feature)
DET_CH = 8               # detector conv channels   -> W1 cols [0, 8)
REC_CH = 16              # recognizer conv channels -> W1 cols [8, 24)
LOGIT_LANE = LANES - 1   # detection logit / prob live in the last output lane


# ------------------------------ fused Pallas kernel ------------------------------ #

def _facenet_kernel(p_ref, mask_ref, w1_ref, w2_ref, out_ref, *,
                    det_bias2, n_chunks, emb_dim):
    """One image per grid step.

    Layout invariants (see weight packing / patch builder):
      * patch rows beyond the real patch count are all-zero (including the bias lane), so
        post-ReLU zero is a safe identity for the running max, and the face mask zeroes
        them for the recognition sum;
      * W1 cols >= DET_CH+REC_CH and W2 rows >= DET_CH+REC_CH are zero, so padded lanes
        never contaminate the pooled row or the merged head matmul.
    """
    f32 = jnp.float32
    w1 = w1_ref[...]                                   # (128, 128) bf16, loaded once

    def chunk_body(c, carry):
        dmax, rsum = carry
        r0 = pl.multiple_of(c * CHUNK, CHUNK)
        patch = p_ref[pl.ds(r0, CHUNK), :]             # (CHUNK, 128) bf16
        mrow = mask_ref[pl.ds(r0, CHUNK), :]           # (CHUNK, 1) f32, carries 1/n_face
        feat = jnp.dot(patch, w1, preferred_element_type=f32)   # (CHUNK, 128) f32
        feat = jnp.maximum(feat, 0.0)                  # ReLU; biases rode in via bias lane
        dmax = jnp.maximum(dmax, jnp.max(feat, axis=0, keepdims=True))
        rsum = rsum + jnp.sum(feat * mrow, axis=0, keepdims=True)
        return dmax, rsum

    zero_row = jnp.zeros((1, LANES), f32)
    dmax, rsum = jax.lax.fori_loop(0, n_chunks, chunk_body, (zero_row, zero_row),
                                   unroll=True)

    # Merge pooled detector channels (lanes [0,8), global max) and recognizer channels
    # (lanes [8,24), face-window mean) into ONE LHS row; single bf16 head matmul:
    #   col LOGIT_LANE = detection logit, cols [0, emb_dim) = raw embedding.
    lane = jax.lax.broadcasted_iota(jnp.int32, (1, LANES), 1)
    pooled = jnp.where(lane < DET_CH, dmax, rsum).astype(jnp.bfloat16)
    head = jnp.dot(pooled, w2_ref[...], preferred_element_type=f32)      # (1, 128) f32

    emb_raw = jnp.where(lane < emb_dim, head, 0.0)
    ss = jnp.sum(emb_raw * emb_raw, axis=1, keepdims=True)
    emb = emb_raw * jax.lax.rsqrt(jnp.maximum(ss, 1e-24))                # L2 norm (EUP)

    prob = jax.nn.sigmoid(head + det_bias2)            # only lane LOGIT_LANE is meaningful
    prob = jnp.where(lane == LOGIT_LANE, prob, 0.0)

    out_ref[...] = emb + prob       # lanes [0, emb_dim) = embedding, lane 127 = prob


# --------------------------------- host-side prep --------------------------------- #

def _build_patches(image_hwc, m_pad):
    """Standardize once in f32 ((x-127.5)/128, shared by both heads), 3x3 valid im2col with
    a trailing constant-1 bias lane, zero-pad rows to m_pad and lanes to LANES, cast bf16.
    Zero padding is exact: padded rows/lanes are no-ops downstream by construction."""
    H, W, C = image_hwc.shape
    oh, ow = H - K + 1, W - K + 1
    m = oh * ow
    x = (image_hwc.astype(jnp.float32) - 127.5) * (1.0 / 128.0)
    taps = [x[dy:dy + oh, dx:dx + ow, :].reshape(m, C)
            for dy in range(K) for dx in range(K)]
    p = jnp.concatenate(taps + [jnp.ones((m, 1), jnp.float32)], axis=1)   # (m, 28)
    p = jnp.pad(p, ((0, m_pad - m), (0, LANES - p.shape[1])))
    return p.astype(jnp.bfloat16)


# ---------------------------------- the pipeline ----------------------------------- #

class FacenetPipelinePallas:
    """Mirrors FacenetPipeline.forward: detect -> prob/threshold gate -> recognition.

    One fused pallas_call over a batch ("parallel" grid axis); __call__ keeps the single-
    image API (with one host read to honour `return None`), forward_batch() stays on-device.
    """

    def __init__(self, training: bool = False, detect_threshold: float = 0.76,
                 face_size: int = 16, emb_dim: int = 32):
        self.detect_threshold = detect_threshold
        self.face_size = int(face_size)
        self.emb_dim = int(emb_dim)
        # TODO(synk): stand-in has no dropout/BN, so eval mode is the only behavior.
        self.training = bool(training)

        self._det_b2 = 3.0  # confident synthetic detector bias
        keys = jax.random.split(jax.random.PRNGKey(42), 4)
        det_w1 = 0.1 * jax.random.normal(keys[0], (KTAPS, DET_CH), jnp.float32)
        det_b1 = jnp.zeros((DET_CH,), jnp.float32)
        det_w2 = 0.1 * jax.random.normal(keys[1], (DET_CH, 1), jnp.float32)
        rec_w1 = 0.1 * jax.random.normal(keys[2], (KTAPS, REC_CH), jnp.float32)
        rec_b1 = 0.01 * jnp.ones((REC_CH,), jnp.float32)
        rec_w2 = 0.1 * jax.random.normal(keys[3], (REC_CH, self.emb_dim), jnp.float32)

        # Merged first layer: det channels cols [0,8), rec channels cols [8,24); first-layer
        # biases ride on the constant bias lane (row 27) of the patch matrix.
        w1 = jnp.zeros((LANES, LANES), jnp.float32)
        w1 = w1.at[:KTAPS, 0:DET_CH].set(det_w1)
        w1 = w1.at[BIAS_ROW, 0:DET_CH].set(det_b1)
        w1 = w1.at[:KTAPS, DET_CH:DET_CH + REC_CH].set(rec_w1)
        w1 = w1.at[BIAS_ROW, DET_CH:DET_CH + REC_CH].set(rec_b1)
        self._w1 = w1.astype(jnp.bfloat16)

        # Merged second layer (bf16; one head matmul in the kernel):
        #   rows [8,24) x cols [0, emb_dim) = rec_w2 (embedding)
        #   rows [0,8)  x col  LOGIT_LANE   = det_w2 (detection logit)
        w2 = jnp.zeros((LANES, LANES), jnp.float32)
        w2 = w2.at[DET_CH:DET_CH + REC_CH, 0:self.emb_dim].set(rec_w2)
        w2 = w2.at[0:DET_CH, LOGIT_LANE].set(det_w2[:, 0])
        self._w2 = w2.astype(jnp.bfloat16)

        self._forward = jax.jit(self._forward_impl)

    def _forward_impl(self, images, w1, w2):
        B, H, W, C = images.shape
        assert C == C_IN, "stand-in expects RGB images"
        oh, ow = H - K + 1, W - K + 1
        m = oh * ow
        m_pad = ((m + CHUNK - 1) // CHUNK) * CHUNK
        n_chunks = m_pad // CHUNK

        # Face-window row mask (constant, folded by XLA): recognition patches are the
        # subset of full-image patch rows inside the center crop; mask carries 1/n_face.
        fs = self.face_size
        y0, x0 = (H - fs) // 2, (W - fs) // 2
        rows = jnp.arange(m_pad)
        oy, ox = rows // ow, rows % ow
        in_face = ((rows < m)
                   & (oy >= y0) & (oy < y0 + fs - K + 1)
                   & (ox >= x0) & (ox < x0 + fs - K + 1))
        mask = in_face.astype(jnp.float32).reshape(m_pad, 1) / float((fs - K + 1) ** 2)

        patches = jax.vmap(functools.partial(_build_patches, m_pad=m_pad))(images)

        kernel = functools.partial(_facenet_kernel,
                                   det_bias2=float(self._det_b2),
                                   n_chunks=int(n_chunks),
                                   emb_dim=self.emb_dim)
        cost = pl.CostEstimate(
            flops=int(2 * B * (m_pad + 1) * LANES * LANES),
            transcendentals=int(2 * B * LANES),
            bytes_accessed=int(B * m_pad * LANES * 2 + m_pad * 4
                               + 2 * LANES * LANES * 2 + B * LANES * 4),
        )
        out = pl.pallas_call(
            kernel,
            out_shape=jax.ShapeDtypeStruct((B, LANES), jnp.float32),
            grid=(B,),
            in_specs=[
                pl.BlockSpec((None, m_pad, LANES), lambda b: (b, 0, 0)),  # per-image patches
                pl.BlockSpec((m_pad, 1), lambda b: (0, 0)),               # shared face mask
                pl.BlockSpec((LANES, LANES), lambda b: (0, 0)),           # merged W1 (bf16)
                pl.BlockSpec((LANES, LANES), lambda b: (0, 0)),           # merged W2 (bf16)
            ],
            out_specs=pl.BlockSpec((1, LANES), lambda b: (b, 0)),
            compiler_params=pltpu.CompilerParams(
                dimension_semantics=("parallel",)),   # batch axis -> v7x 2-TC shardable
            cost_estimate=cost,
        )(patches, mask, w1, w2)

        emb = out[:, :self.emb_dim]
        prob = out[:, LOGIT_LANE]
        return emb, prob

    def forward_batch(self, images):
        """Batched path: no per-image host sync. Returns (emb (B,emb_dim), prob (B,), valid (B,))."""
        emb, prob = self._forward(images, self._w1, self._w2)
        if self.detect_threshold is None:
            valid = jnp.ones(prob.shape, jnp.bool_)
        else:
            valid = prob >= self.detect_threshold
        return emb, prob, valid

    def __call__(self, image):
        emb, prob = self._forward(image[None], self._w1, self._w2)
        # Single device->host read AFTER the fused kernel, required only to honour the
        # PyTorch-style `return None` contract; use forward_batch() to stay on-device.
        if self.detect_threshold is not None:
            if float(jax.device_get(prob[0])) < self.detect_threshold:
                return None
        return emb, prob[0]


# -------------------------------------- main -------------------------------------- #

if __name__ == "__main__":
    key0, key1 = jax.random.split(jax.random.PRNGKey(0))
    # Small synthetic "image": 32x32 RGB, values in [0, 255] (HWC layout).
    image = jax.random.uniform(key0, (32, 32, 3), jnp.float32, 0.0, 255.0)

    pipeline = FacenetPipelinePallas(training=False, detect_threshold=0.76)
    out = pipeline(image)
    if out is None:
        # Detection below threshold -> pipeline returns None (valid outcome).
        jax.block_until_ready(image)
    else:
        emb, prob = out
        jax.block_until_ready(emb)
        jax.block_until_ready(prob)
        assert emb.shape == (1, pipeline.emb_dim)

    # Batched path: amortizes dispatch, no per-image host sync, "parallel" batch grid axis.
    images = jax.random.uniform(key1, (2, 32, 32, 3), jnp.float32, 0.0, 255.0)
    embs, probs, valid = pipeline.forward_batch(images)
    jax.block_until_ready(embs)
    jax.block_until_ready(probs)
    assert embs.shape == (2, pipeline.emb_dim)

    print("KERNEL_OK")
</pallas_src>

<mosaic_0001>
module attributes {stable_mosaic.version = 11 : i64} {
  func.func @_facenet_kernel(%arg0: i32, %arg1: memref<1x1024x128xbf16, #tpu.memory_space<vmem>>, %arg2: memref<1024x1xf32, #tpu.memory_space<vmem>>, %arg3: memref<128x128xbf16, #tpu.memory_space<vmem>>, %arg4: memref<128x128xbf16, #tpu.memory_space<vmem>>, %arg5: memref<1x128xf32, #tpu.memory_space<vmem>>) attributes {dimension_semantics = [#tpu.dimension_semantics<parallel>], iteration_bounds = array<i64: 1>, scalar_prefetch = 0 : i64, scratch_operands = 0 : i64, tpu.core_type = #tpu.core_type<tc>, window_params = [{transform_indices = @transform_0, window_bounds = array<i64: 1, 1024, 128>}, {pipeline_mode = #tpu.pipeline_mode<synchronous>, transform_indices = @transform_1, window_bounds = array<i64: 1024, 1>}, {pipeline_mode = #tpu.pipeline_mode<synchronous>, transform_indices = @transform_2, window_bounds = array<i64: 128, 128>}, {pipeline_mode = #tpu.pipeline_mode<synchronous>, transform_indices = @transform_3, window_bounds = array<i64: 128, 128>}, {transform_indices = @transform_4, window_bounds = array<i64: 1, 128>}]} {
    %c0 = arith.constant 0 : index
    %c0_0 = arith.constant 0 : index
    %0 = vector.load %arg3[%c0, %c0_0] : memref<128x128xbf16, #tpu.memory_space<vmem>>, vector<128x128xbf16>
    %cst = arith.constant 0.000000e+00 : f32
    %1 = vector.broadcast %cst : f32 to vector<1x128xf32>
    %c0_i32 = arith.constant 0 : i32
    %c128_i32 = arith.constant 128 : i32
    %2 = arith.muli %c0_i32, %c128_i32 : i32
    %3 = tpu.assume_multiple %2, 128 : i32
    %c0_1 = arith.constant 0 : index
    %4 = arith.index_cast %3 : i32 to index
    %c0_2 = arith.constant 0 : index
    %5 = vector.load %arg1[%c0_1, %4, %c0_2] : memref<1x1024x128xbf16, #tpu.memory_space<vmem>>, vector<1x128x128xbf16>
    %6 = vector.shape_cast %5 : vector<1x128x128xbf16> to vector<128x128xbf16>
    %7 = arith.index_cast %3 : i32 to index
    %c0_3 = arith.constant 0 : index
    %8 = vector.load %arg2[%7, %c0_3] : memref<1024x1xf32, #tpu.memory_space<vmem>>, vector<128x1xf32>
    %cst_4 = arith.constant dense<0.000000e+00> : vector<128x128xf32>
    %9 = tpu.matmul %6, %0, %cst_4 {dimension_numbers = #tpu.dot_dimension_numbers<[1], [0], [0], [1], [0, 0, 1, 1], [], []>} : vector<128x128xbf16>, vector<128x128xbf16>, vector<128x128xf32> -> vector<128x128xf32>
    %cst_5 = arith.constant 0.000000e+00 : f32
    %10 = vector.broadcast %cst_5 : f32 to vector<128x128xf32>
    %11 = arith.maximumf %9, %10 : vector<128x128xf32>
    %cst_6 = arith.constant dense<0xFF800000> : vector<128xf32>
    %12 = vector.multi_reduction <maximumf>, %11, %cst_6 [0] : vector<128x128xf32> to vector<128xf32>
    %13 = vector.shape_cast %12 : vector<128xf32> to vector<1x128xf32>
    %14 = arith.maximumf %1, %13 : vector<1x128xf32>
    %15 = vector.broadcast %8 : vector<128x1xf32> to vector<128x128xf32>
    %16 = arith.mulf %11, %15 : vector<128x128xf32>
    %cst_7 = arith.constant dense<0.000000e+00> : vector<128xf32>
    %17 = vector.multi_reduction <add>, %16, %cst_7 [0] : vector<128x128xf32> to vector<128xf32>
    %18 = vector.shape_cast %17 : vector<128xf32> to vector<1x128xf32>
    %19 = arith.addf %1, %18 : vector<1x128xf32>
    %c1_i32 = arith.constant 1 : i32
    %c128_i32_8 = arith.constant 128 : i32
    %20 = arith.muli %c1_i32, %c128_i32_8 : i32
    %21 = tpu.assume_multiple %20, 128 : i32
    %c0_9 = arith.constant 0 : index
    %22 = arith.index_cast %21 : i32 to index
    %c0_10 = arith.constant 0 : index
    %23 = vector.load %arg1[%c0_9, %22, %c0_10] : memref<1x1024x128xbf16, #tpu.memory_space<vmem>>, vector<1x128x128xbf16>
    %24 = vector.shape_cast %23 : vector<1x128x128xbf16> to vector<128x128xbf16>
    %25 = arith.index_cast %21 : i32 to index
    %c0_11 = arith.constant 0 : index
    %26 = vector.load %arg2[%25, %c0_11] : memref<1024x1xf32, #tpu.memory_space<vmem>>, vector<128x1xf32>
    %cst_12 = arith.constant dense<0.000000e+00> : vector<128x128xf32>
    %27 = tpu.matmul %24, %0, %cst_12 {dimension_numbers = #tpu.dot_dimension_numbers<[1], [0], [0], [1], [0, 0, 1, 1], [], []>} : vector<128x128xbf16>, vector<128x128xbf16>, vector<128x128xf32> -> vector<128x128xf32>
    %cst_13 = arith.constant 0.000000e+00 : f32
    %28 = vector.broadcast %cst_13 : f32 to vector<128x128xf32>
    %29 = arith.maximumf %27, %28 : vector<128x128xf32>
    %cst_14 = arith.constant dense<0xFF800000> : vector<128xf32>
    %30 = vector.multi_reduction <maximumf>, %29, %cst_14 [0] : vector<128x128xf32> to vector<128xf32>
    %31 = vector.shape_cast %30 : vector<128xf32> to vector<1x128xf32>
    %32 = arith.maximumf %14, %31 : vector<1x128xf32>
    %33 = vector.broadcast %26 : vector<128x1xf32> to vector<128x128xf32>
    %34 = arith.mulf %29, %33 : vector<128x128xf32>
    %cst_15 = arith.constant dense<0.000000e+00> : vector<128xf32>
    %35 = vector.multi_reduction <add>, %34, %cst_15 [0] : vector<128x128xf32> to vector<128xf32>
    %36 = vector.shape_cast %35 : vector<128xf32> to vector<1x128xf32>
    %37 = arith.addf %19, %36 : vector<1x128xf32>
    %c2_i32 = arith.constant 2 : i32
    %c128_i32_16 = arith.constant 128 : i32
    %38 = arith.muli %c2_i32, %c128_i32_16 : i32
    %39 = tpu.assume_multiple %38, 128 : i32
    %c0_17 = arith.constant 0 : index
    %40 = arith.index_cast %39 : i32 to index
    %c0_18 = arith.constant 0 : index
    %41 = vector.load %arg1[%c0_17, %40, %c0_18] : memref<1x1024x128xbf16, #tpu.memory_space<vmem>>, vector<1x128x128xbf16>
    %42 = vector.shape_cast %41 : vector<1x128x128xbf16> to vector<128x128xbf16>
    %43 = arith.index_cast %39 : i32 to index
    %c0_19 = arith.constant 0 : index
    %44 = vector.load %arg2[%43, %c0_19] : memref<1024x1xf32, #tpu.memory_space<vmem>>, vector<128x1xf32>
    %cst_20 = arith.constant dense<0.000000e+00> : vector<128x128xf32>
    %45 = tpu.matmul %42, %0, %cst_20 {dimension_numbers = #tpu.dot_dimension_numbers<[1], [0], [0], [1], [0, 0, 1, 1], [], []>} : vector<128x128xbf16>, vector<128x128xbf16>, vector<128x128xf32> -> vector<128x128xf32>
    %cst_21 = arith.constant 0.000000e+00 : f32
    %46 = vector.broadcast %cst_21 : f32 to vector<128x128xf32>
    %47 = arith.maximumf %45, %46 : vector<128x128xf32>
    %cst_22 = arith.constant dense<0xFF800000> : vector<128xf32>
    %48 = vector.multi_reduction <maximumf>, %47, %cst_22 [0] : vector<128x128xf32> to vector<128xf32>
    %49 = vector.shape_cast %48 : vector<128xf32> to vector<1x128xf32>
    %50 = arith.maximumf %32, %49 : vector<1x128xf32>
    %51 = vector.broadcast %44 : vector<128x1xf32> to vector<128x128xf32>
    %52 = arith.mulf %47, %51 : vector<128x128xf32>
    %cst_23 = arith.constant dense<0.000000e+00> : vector<128xf32>
    %53 = vector.multi_reduction <add>, %52, %cst_23 [0] : vector<128x128xf32> to vector<128xf32>
    %54 = vector.shape_cast %53 : vector<128xf32> to vector<1x128xf32>
    %55 = arith.addf %37, %54 : vector<1x128xf32>
    %c3_i32 = arith.constant 3 : i32
    %c128_i32_24 = arith.constant 128 : i32
    %56 = arith.muli %c3_i32, %c128_i32_24 : i32
    %57 = tpu.assume_multiple %56, 128 : i32
    %c0_25 = arith.constant 0 : index
    %58 = arith.index_cast %57 : i32 to index
    %c0_26 = arith.constant 0 : index
    %59 = vector.load %arg1[%c0_25, %58, %c0_26] : memref<1x1024x128xbf16, #tpu.memory_space<vmem>>, vector<1x128x128xbf16>
    %60 = vector.shape_cast %59 : vector<1x128x128xbf16> to vector<128x128xbf16>
    %61 = arith.index_cast %57 : i32 to index
    %c0_27 = arith.constant 0 : index
    %62 = vector.load %arg2[%61, %c0_27] : memref<1024x1xf32, #tpu.memory_space<vmem>>, vector<128x1xf32>
    %cst_28 = arith.constant dense<0.000000e+00> : vector<128x128xf32>
    %63 = tpu.matmul %60, %0, %cst_28 {dimension_numbers = #tpu.dot_dimension_numbers<[1], [0], [0], [1], [0, 0, 1, 1], [], []>} : vector<128x128xbf16>, vector<128x128xbf16>, vector<128x128xf32> -> vector<128x128xf32>
    %cst_29 = arith.constant 0.000000e+00 : f32
    %64 = vector.broadcast %cst_29 : f32 to vector<128x128xf32>
    %65 = arith.maximumf %63, %64 : vector<128x128xf32>
    %cst_30 = arith.constant dense<0xFF800000> : vector<128xf32>
    %66 = vector.multi_reduction <maximumf>, %65, %cst_30 [0] : vector<128x128xf32> to vector<128xf32>
    %67 = vector.shape_cast %66 : vector<128xf32> to vector<1x128xf32>
    %68 = arith.maximumf %50, %67 : vector<1x128xf32>
    %69 = vector.broadcast %62 : vector<128x1xf32> to vector<128x128xf32>
    %70 = arith.mulf %65, %69 : vector<128x128xf32>
    %cst_31 = arith.constant dense<0.000000e+00> : vector<128xf32>
    %71 = vector.multi_reduction <add>, %70, %cst_31 [0] : vector<128x128xf32> to vector<128xf32>
    %72 = vector.shape_cast %71 : vector<128xf32> to vector<1x128xf32>
    %73 = arith.addf %55, %72 : vector<1x128xf32>
    %c4_i32 = arith.constant 4 : i32
    %c128_i32_32 = arith.constant 128 : i32
    %74 = arith.muli %c4_i32, %c128_i32_32 : i32
    %75 = tpu.assume_multiple %74, 128 : i32
    %c0_33 = arith.constant 0 : index
    %76 = arith.index_cast %75 : i32 to index
    %c0_34 = arith.constant 0 : index
    %77 = vector.load %arg1[%c0_33, %76, %c0_34] : memref<1x1024x128xbf16, #tpu.memory_space<vmem>>, vector<1x128x128xbf16>
    %78 = vector.shape_cast %77 : vector<1x128x128xbf16> to vector<128x128xbf16>
    %79 = arith.index_cast %75 : i32 to index
    %c0_35 = arith.constant 0 : index
    %80 = vector.load %arg2[%79, %c0_35] : memref<1024x1xf32, #tpu.memory_space<vmem>>, vector<128x1xf32>
    %cst_36 = arith.constant dense<0.000000e+00> : vector<128x128xf32>
    %81 = tpu.matmul %78, %0, %cst_36 {dimension_numbers = #tpu.dot_dimension_numbers<[1], [0], [0], [1], [0, 0, 1, 1], [], []>} : vector<128x128xbf16>, vector<128x128xbf16>, vector<128x128xf32> -> vector<128x128xf32>
    %cst_37 = arith.constant 0.000000e+00 : f32
    %82 = vector.broadcast %cst_37 : f32 to vector<128x128xf32>
    %83 = arith.maximumf %81, %82 : vector<128x128xf32>
    %cst_38 = arith.constant dense<0xFF800000> : vector<128xf32>
    %84 = vector.multi_reduction <maximumf>, %83, %cst_38 [0] : vector<128x128xf32> to vector<128xf32>
    %85 = vector.shape_cast %84 : vector<128xf32> to vector<1x128xf32>
    %86 = arith.maximumf %68, %85 : vector<1x128xf32>
    %87 = vector.broadcast %80 : vector<128x1xf32> to vector<128x128xf32>
    %88 = arith.mulf %83, %87 : vector<128x128xf32>
    %cst_39 = arith.constant dense<0.000000e+00> : vector<128xf32>
    %89 = vector.multi_reduction <add>, %88, %cst_39 [0] : vector<128x128xf32> to vector<128xf32>
    %90 = vector.shape_cast %89 : vector<128xf32> to vector<1x128xf32>
    %91 = arith.addf %73, %90 : vector<1x128xf32>
    %c5_i32 = arith.constant 5 : i32
    %c128_i32_40 = arith.constant 128 : i32
    %92 = arith.muli %c5_i32, %c128_i32_40 : i32
    %93 = tpu.assume_multiple %92, 128 : i32
    %c0_41 = arith.constant 0 : index
    %94 = arith.index_cast %93 : i32 to index
    %c0_42 = arith.constant 0 : index
    %95 = vector.load %arg1[%c0_41, %94, %c0_42] : memref<1x1024x128xbf16, #tpu.memory_space<vmem>>, vector<1x128x128xbf16>
    %96 = vector.shape_cast %95 : vector<1x128x128xbf16> to vector<128x128xbf16>
    %97 = arith.index_cast %93 : i32 to index
    %c0_43 = arith.constant 0 : index
    %98 = vector.load %arg2[%97, %c0_43] : memref<1024x1xf32, #tpu.memory_space<vmem>>, vector<128x1xf32>
    %cst_44 = arith.constant dense<0.000000e+00> : vector<128x128xf32>
    %99 = tpu.matmul %96, %0, %cst_44 {dimension_numbers = #tpu.dot_dimension_numbers<[1], [0], [0], [1], [0, 0, 1, 1], [], []>} : vector<128x128xbf16>, vector<128x128xbf16>, vector<128x128xf32> -> vector<128x128xf32>
    %cst_45 = arith.constant 0.000000e+00 : f32
    %100 = vector.broadcast %cst_45 : f32 to vector<128x128xf32>
    %101 = arith.maximumf %99, %100 : vector<128x128xf32>
    %cst_46 = arith.constant dense<0xFF800000> : vector<128xf32>
    %102 = vector.multi_reduction <maximumf>, %101, %cst_46 [0] : vector<128x128xf32> to vector<128xf32>
    %103 = vector.shape_cast %102 : vector<128xf32> to vector<1x128xf32>
    %104 = arith.maximumf %86, %103 : vector<1x128xf32>
    %105 = vector.broadcast %98 : vector<128x1xf32> to vector<128x128xf32>
    %106 = arith.mulf %101, %105 : vector<128x128xf32>
    %cst_47 = arith.constant dense<0.000000e+00> : vector<128xf32>
    %107 = vector.multi_reduction <add>, %106, %cst_47 [0] : vector<128x128xf32> to vector<128xf32>
    %108 = vector.shape_cast %107 : vector<128xf32> to vector<1x128xf32>
    %109 = arith.addf %91, %108 : vector<1x128xf32>
    %c6_i32 = arith.constant 6 : i32
    %c128_i32_48 = arith.constant 128 : i32
    %110 = arith.muli %c6_i32, %c128_i32_48 : i32
    %111 = tpu.assume_multiple %110, 128 : i32
    %c0_49 = arith.constant 0 : index
    %112 = arith.index_cast %111 : i32 to index
    %c0_50 = arith.constant 0 : index
    %113 = vector.load %arg1[%c0_49, %112, %c0_50] : memref<1x1024x128xbf16, #tpu.memory_space<vmem>>, vector<1x128x128xbf16>
    %114 = vector.shape_cast %113 : vector<1x128x128xbf16> to vector<128x128xbf16>
    %115 = arith.index_cast %111 : i32 to index
    %c0_51 = arith.constant 0 : index
    %116 = vector.load %arg2[%115, %c0_51] : memref<1024x1xf32, #tpu.memory_space<vmem>>, vector<128x1xf32>
    %cst_52 = arith.constant dense<0.000000e+00> : vector<128x128xf32>
    %117 = tpu.matmul %114, %0, %cst_52 {dimension_numbers = #tpu.dot_dimension_numbers<[1], [0], [0], [1], [0, 0, 1, 1], [], []>} : vector<128x128xbf16>, vector<128x128xbf16>, vector<128x128xf32> -> vector<128x128xf32>
    %cst_53 = arith.constant 0.000000e+00 : f32
    %118 = vector.broadcast %cst_53 : f32 to vector<128x128xf32>
    %119 = arith.maximumf %117, %118 : vector<128x128xf32>
    %cst_54 = arith.constant dense<0xFF800000> : vector<128xf32>
    %120 = vector.multi_reduction <maximumf>, %119, %cst_54 [0] : vector<128x128xf32> to vector<128xf32>
    %121 = vector.shape_cast %120 : vector<128xf32> to vector<1x128xf32>
    %122 = arith.maximumf %104, %121 : vector<1x128xf32>
    %123 = vector.broadcast %116 : vector<128x1xf32> to vector<128x128xf32>
    %124 = arith.mulf %119, %123 : vector<128x128xf32>
    %cst_55 = arith.constant dense<0.000000e+00> : vector<128xf32>
    %125 = vector.multi_reduction <add>, %124, %cst_55 [0] : vector<128x128xf32> to vector<128xf32>
    %126 = vector.shape_cast %125 : vector<128xf32> to vector<1x128xf32>
    %127 = arith.addf %109, %126 : vector<1x128xf32>
    %c7_i32 = arith.constant 7 : i32
    %c128_i32_56 = arith.constant 128 : i32
    %128 = arith.muli %c7_i32, %c128_i32_56 : i32
    %129 = tpu.assume_multiple %128, 128 : i32
    %c0_57 = arith.constant 0 : index
    %130 = arith.index_cast %129 : i32 to index
    %c0_58 = arith.constant 0 : index
    %131 = vector.load %arg1[%c0_57, %130, %c0_58] : memref<1x1024x128xbf16, #tpu.memory_space<vmem>>, vector<1x128x128xbf16>
    %132 = vector.shape_cast %131 : vector<1x128x128xbf16> to vector<128x128xbf16>
    %133 = arith.index_cast %129 : i32 to index
    %c0_59 = arith.constant 0 : index
    %134 = vector.load %arg2[%133, %c0_59] : memref<1024x1xf32, #tpu.memory_space<vmem>>, vector<128x1xf32>
    %cst_60 = arith.constant dense<0.000000e+00> : vector<128x128xf32>
    %135 = tpu.matmul %132, %0, %cst_60 {dimension_numbers = #tpu.dot_dimension_numbers<[1], [0], [0], [1], [0, 0, 1, 1], [], []>} : vector<128x128xbf16>, vector<128x128xbf16>, vector<128x128xf32> -> vector<128x128xf32>
    %cst_61 = arith.constant 0.000000e+00 : f32
    %136 = vector.broadcast %cst_61 : f32 to vector<128x128xf32>
    %137 = arith.maximumf %135, %136 : vector<128x128xf32>
    %cst_62 = arith.constant dense<0xFF800000> : vector<128xf32>
    %138 = vector.multi_reduction <maximumf>, %137, %cst_62 [0] : vector<128x128xf32> to vector<128xf32>
    %139 = vector.shape_cast %138 : vector<128xf32> to vector<1x128xf32>
    %140 = arith.maximumf %122, %139 : vector<1x128xf32>
    %141 = vector.broadcast %134 : vector<128x1xf32> to vector<128x128xf32>
    %142 = arith.mulf %137, %141 : vector<128x128xf32>
    %cst_63 = arith.constant dense<0.000000e+00> : vector<128xf32>
    %143 = vector.multi_reduction <add>, %142, %cst_63 [0] : vector<128x128xf32> to vector<128xf32>
    %144 = vector.shape_cast %143 : vector<128xf32> to vector<1x128xf32>
    %145 = arith.addf %127, %144 : vector<1x128xf32>
    %c8_i32 = arith.constant 8 : i32
    %146 = tpu.iota {dimensions = array<i32: 1>} : vector<1x128xi32>
    %c8_i32_64 = arith.constant 8 : i32
    %147 = vector.broadcast %c8_i32_64 : i32 to vector<1x128xi32>
    %148 = arith.cmpi slt, %146, %147 : vector<1x128xi32>
    %149 = arith.select %148, %140, %145 : vector<1x128xi1>, vector<1x128xf32>
    %150 = arith.truncf %149 : vector<1x128xf32> to vector<1x128xbf16>
    %c0_65 = arith.constant 0 : index
    %c0_66 = arith.constant 0 : index
    %151 = vector.load %arg4[%c0_65, %c0_66] : memref<128x128xbf16, #tpu.memory_space<vmem>>, vector<128x128xbf16>
    %cst_67 = arith.constant dense<0.000000e+00> : vector<1x128xf32>
    %152 = tpu.matmul %150, %151, %cst_67 {dimension_numbers = #tpu.dot_dimension_numbers<[1], [0], [0], [1], [0, 0, 1, 1], [], []>} : vector<1x128xbf16>, vector<128x128xbf16>, vector<1x128xf32> -> vector<1x128xf32>
    %c32_i32 = arith.constant 32 : i32
    %153 = vector.broadcast %c32_i32 : i32 to vector<1x128xi32>
    %154 = arith.cmpi slt, %146, %153 : vector<1x128xi32>
    %cst_68 = arith.constant 0.000000e+00 : f32
    %155 = vector.broadcast %cst_68 : f32 to vector<1x128xf32>
    %156 = arith.select %154, %152, %155 : vector<1x128xi1>, vector<1x128xf32>
    %157 = arith.mulf %156, %156 : vector<1x128xf32>
    %cst_69 = arith.constant dense<0.000000e+00> : vector<1xf32>
    %158 = vector.multi_reduction <add>, %157, %cst_69 [1] : vector<1x128xf32> to vector<1xf32>
    %159 = vector.shape_cast %158 : vector<1xf32> to vector<1x1xf32>
    %cst_70 = arith.constant 1.000000e-24 : f32
    %160 = vector.broadcast %cst_70 : f32 to vector<1x1xf32>
    %161 = arith.maximumf %159, %160 : vector<1x1xf32>
    %162 = math.rsqrt %161 : vector<1x1xf32>
    %163 = vector.broadcast %162 : vector<1x1xf32> to vector<1x128xf32>
    %164 = arith.mulf %156, %163 : vector<1x128xf32>
    %cst_71 = arith.constant 3.000000e+00 : f32
    %165 = vector.broadcast %cst_71 : f32 to vector<1x128xf32>
    %166 = arith.addf %152, %165 : vector<1x128xf32>
    %167 = arith.negf %166 : vector<1x128xf32>
    %168 = math.exp %167 : vector<1x128xf32>
    %cst_72 = arith.constant 1.000000e+00 : f32
    %169 = vector.broadcast %cst_72 : f32 to vector<1x128xf32>
    %170 = arith.addf %169, %168 : vector<1x128xf32>
    %171 = arith.divf %169, %170 : vector<1x128xf32>
    %c127_i32 = arith.constant 127 : i32
    %172 = vector.broadcast %c127_i32 : i32 to vector<1x128xi32>
    %173 = arith.cmpi eq, %146, %172 : vector<1x128xi32>
    %cst_73 = arith.constant 0.000000e+00 : f32
    %174 = vector.broadcast %cst_73 : f32 to vector<1x128xf32>
    %175 = arith.select %173, %171, %174 : vector<1x128xi1>, vector<1x128xf32>
    %176 = arith.addf %164, %175 : vector<1x128xf32>
    %c0_74 = arith.constant 0 : index
    %c0_75 = arith.constant 0 : index
    %177 = vector.load %arg5[%c0_74, %c0_75] : memref<1x128xf32, #tpu.memory_space<vmem>>, vector<1x128xf32>
    tpu.vector_store %arg5[%c0_74, %c0_75], %176 {strides = array<i32>} : memref<1x128xf32, #tpu.memory_space<vmem>>, vector<1x128xf32>,
    return
  }
  func.func @transform_0(%arg0: i32) -> (i32, i32, i32) {
    %c0_i32 = arith.constant 0 : i32
    %c0_i32_0 = arith.constant 0 : i32
    %c0_i32_1 = arith.constant 0 : i32
    return %arg0, %c0_i32, %c0_i32_0 : i32, i32, i32
  }
  func.func @transform_1(%arg0: i32) -> (i32, i32) {
    %c0_i32 = arith.constant 0 : i32
    %c0_i32_0 = arith.constant 0 : i32
    %c0_i32_1 = arith.constant 0 : i32
    return %c0_i32, %c0_i32_0 : i32, i32
  }
  func.func @transform_2(%arg0: i32) -> (i32, i32) {
    %c0_i32 = arith.constant 0 : i32
    %c0_i32_0 = arith.constant 0 : i32
    %c0_i32_1 = arith.constant 0 : i32
    return %c0_i32, %c0_i32_0 : i32, i32
  }
  func.func @transform_3(%arg0: i32) -> (i32, i32) {
    %c0_i32 = arith.constant 0 : i32
    %c0_i32_0 = arith.constant 0 : i32
    %c0_i32_1 = arith.constant 0 : i32
    return %c0_i32, %c0_i32_0 : i32, i32
  }
  func.func @transform_4(%arg0: i32) -> (i32, i32) {
    %c0_i32 = arith.constant 0 : i32
    %c0_i32_0 = arith.constant 0 : i32
    return %arg0, %c0_i32 : i32, i32
  }
}

</mosaic_0001>

<bundles_post_ra>
// kernel: _forward_impl.1
= control target key start
LH: loop header
LB: loop body
LE: loop exit
PB: predicated region body
PF: predicated region fallthrough
CT: control target
= control target key end

     0   :  { %v3703_v0 = vmov 0   ;;  %vm3705_vm0 = vmmov 0   ;;  %vm2872_vm3 = vcmask 1040384   ;;  %s5259_s1 = inlined_call_operand.vmem [shape: f32[1024,1], index: 1, kind: input, shape index: {}]   ;;  %s5260_s2 = inlined_call_operand.vmem [shape: bf16[128,128], index: 2, kind: input, shape index: {}]   ;;  %s5261_s0 = inlined_call_operand.vmem [shape: bf16[1,1024,128], index: 0, kind: input, shape index: {}]   ;;  %s5262_s3 = inlined_call_operand.vmem [shape: bf16[128,128], index: 3, kind: input, shape index: {}]   ;;  %s5263_s4 = inlined_call_operand.vmem [shape: f32[1,128], index: 4, kind: output, shape index: {}]  }
   0x1   :  { %3616 = vset.pattern.permute.xlu1 %v3703_v0  ;;  %3615 = vset.pattern.permute.xlu0 %v3703_v0  ;;  %v52_v1 = vld [vmem:[%s5259_s1 + $0x10] sm:$0xff]  ;;  %v50_v2 = vld [vmem:[%s5259_s1] sm:$0xff]  ;;  %v53_v4 = vld [vmem:[%s5259_s1 + $0x18] sm:$0xff] }
   0x2   :  { %309 = vperm.xlu1 %3616, %v52_v1   ;;  %299 = vperm.xlu0 %3615, %v50_v2   ;;  %v3740_v3 = vld [vmem:[%s5260_s2] sm:$0xff]   ;;  %v51_v5 = vld [vmem:[%s5259_s1 + $0x8] sm:$0xff]  ;;  %v3768_v9 = vld [vmem:[%s5260_s2 + $0x10] sm:$0xff]  }
   0x3   :  { %3336 = vmatprep.subr.bf16.mxu0 %v3740_v3  ;;  %3368 = vmatprep.subr.bf16.mxu1 %v3740_v3  ;;  %v3753_v6 = vld [vmem:[%s5260_s2 + $0x8] sm:$0xff]   ;;  %v54_v8 = vld [vmem:[%s5259_s1 + $0x20] sm:$0xff]  ;;  %v57_v10 = vld [vmem:[%s5259_s1 + $0x38] sm:$0xff] }
   0x4   :  { %3337 = vmatpush3.bf16.msra.mxu0 %v3740_v3  ;;  %3369 = vmatpush3.bf16.msra.mxu1 %v3740_v3  ;;  %v55_v7 = vld [vmem:[%s5259_s1 + $0x28] sm:$0xff]  ;;  %v56_v11 = vld [vmem:[%s5259_s1 + $0x30] sm:$0xff]  ;;  %v3783_v12 = vld [vmem:[%s5260_s2 + $0x18] sm:$0xff]  }
   0x5   :  { %3338 = vmatprep.subr.bf16.mxu0 %v3753_v6  ;;  %3370 = vmatprep.subr.bf16.mxu1 %v3753_v6  ;;  %v59_v13 = vld [vmem:[%s5259_s1 + $0x48] sm:$0xff]  ;;  %v58_v14 = vld [vmem:[%s5259_s1 + $0x40] sm:$0xff]  ;;  %v61_v18 = vld [vmem:[%s5259_s1 + $0x58] sm:$0xff] }
   0x6   :  { %314 = vperm.xlu1 %3616, %v53_v4   ;;  %304 = vperm.xlu0 %3615, %v51_v5   ;;  %v3796_v15 = vld [vmem:[%s5260_s2 + $0x20] sm:$0xff]   ;;  %v60_v19 = vld [vmem:[%s5259_s1 + $0x50] sm:$0xff]  ;;  %v3819_v20 = vld [vmem:[%s5260_s2 + $0x28] sm:$0xff]  }
   0x7   :  { %v3625_v16 = vld [vmem:[%s5261_s0] sm:$0xff]   ;;  %v63_v21 = vld [vmem:[%s5259_s1 + $0x68] sm:$0xff]  ;;  %v3834_v23 = vld [vmem:[%s5260_s2 + $0x30] sm:$0xff]  }
   0x8   :  { %3339 = vmatpush3.bf16.msra.mxu0 %v3753_v6  ;;  %3371 = vmatpush3.bf16.msra.mxu1 %v3753_v6  ;;  %v3626_v17 = vld [vmem:[%s5261_s0 + $0x40] sm:$0xff]   ;;  %v65_v24 = vld [vmem:[%s5259_s1 + $0x78] sm:$0xff]  ;;  %v64_v25 = vld [vmem:[%s5259_s1 + $0x70] sm:$0xff] }
   0x9   :  { %3340 = vmatprep.subr.bf16.mxu0 %v3768_v9  ;;  %3372 = vmatprep.subr.bf16.mxu1 %v3768_v9  ;;  %v62_v22 = vld [vmem:[%s5259_s1 + $0x60] sm:$0xff]  ;;  %v3849_v26 = vld [vmem:[%s5260_s2 + $0x38] sm:$0xff]   ;;  %v2927_v27 = vld [vmem:[%s5259_s1 + $0x88] sm:$0xff] }
   0xa   :  { %324 = vperm.xlu1 %3616, %v55_v7   ;;  %319 = vperm.xlu0 %3615, %v54_v8   ;;  %v2926_v28 = vld [vmem:[%s5259_s1 + $0x80] sm:$0xff]  ;;  %v3627_v29 = vld [vmem:[%s5261_s0 + $0x8] sm:$0xff]   ;;  %v2929_v31 = vld [vmem:[%s5259_s1 + $0x98] sm:$0xff] }
   0xb   :  { %3352 = vmatprep.mubr.bf16.mxu0 %v3625_v16  ;;  %3384 = vmatprep.mubr.bf16.mxu1 %v3626_v17  ;;  %v3628_v30 = vld [vmem:[%s5261_s0 + $0x48] sm:$0xff]   ;;  %v2928_v32 = vld [vmem:[%s5259_s1 + $0x90] sm:$0xff]  ;;  %v2930_v36 = vld [vmem:[%s5259_s1 + $0xa0] sm:$0xff] }
   0xc   :  { %3341 = vmatpush3.bf16.msra.mxu0 %v3768_v9  ;;  %3373 = vmatpush3.bf16.msra.mxu1 %v3768_v9  ;;  %v3629_v33 = vld [vmem:[%s5261_s0 + $0x10] sm:$0xff]   ;;  %v2931_v35 = vld [vmem:[%s5259_s1 + $0xa8] sm:$0xff]  ;;  %v3631_v37 = vld [vmem:[%s5261_s0 + $0x18] sm:$0xff]  }
   0xd   :  { %3342 = vmatprep.subr.bf16.mxu0 %v3783_v12  ;;  %3374 = vmatprep.subr.bf16.mxu1 %v3783_v12  ;;  %v3630_v34 = vld [vmem:[%s5261_s0 + $0x50] sm:$0xff]   ;;  %v3632_v38 = vld [vmem:[%s5261_s0 + $0x58] sm:$0xff]   ;;  %v3633_v41 = vld [vmem:[%s5261_s0 + $0x20] sm:$0xff]  }
   0xe   :  { %334 = vperm.xlu1 %3616, %v57_v10   ;;  %329 = vperm.xlu0 %3615, %v56_v11   ;;  %v2933_v39 = vld [vmem:[%s5259_s1 + $0xb8] sm:$0xff]  ;;  %v2932_v40 = vld [vmem:[%s5259_s1 + $0xb0] sm:$0xff]  ;;  %v3634_v42 = vld [vmem:[%s5261_s0 + $0x60] sm:$0xff]  }
   0xf   :  { %v2966_v43 = vld [vmem:[%s5259_s1 + $0x100] sm:$0xff]  ;;  %v3635_v45 = vld [vmem:[%s5261_s0 + $0x28] sm:$0xff]   ;;  %v2968_v47 = vld [vmem:[%s5259_s1 + $0x110] sm:$0xff] }
  0x10   :  { %3343 = vmatpush3.bf16.msra.mxu0 %v3783_v12  ;;  %3375 = vmatpush3.bf16.msra.mxu1 %v3783_v12  ;;  %v2934_v44 = vld [vmem:[%s5259_s1 + $0xc0] sm:$0xff]  ;;  %v3636_v46 = vld [vmem:[%s5261_s0 + $0x68] sm:$0xff]   ;;  %v3637_v49 = vld [vmem:[%s5261_s0 + $0x30] sm:$0xff]  }
  0x11   :  { %3344 = vmatprep.subr.bf16.mxu0 %v3796_v15  ;;  %3376 = vmatprep.subr.bf16.mxu1 %v3796_v15  ;;  %v2967_v48 = vld [vmem:[%s5259_s1 + $0x108] sm:$0xff]  ;;  %v3638_v50 = vld [vmem:[%s5261_s0 + $0x70] sm:$0xff]   ;;  %v3006_v52 = vld [vmem:[%s5259_s1 + $0x180] sm:$0xff] }
  0x12   :  { %344 = vperm.xlu1 %3616, %v59_v13   ;;  %339 = vperm.xlu0 %3615, %v58_v14   ;;  %v3007_v51 = vld [vmem:[%s5259_s1 + $0x188] sm:$0xff]  ;;  %v3639_v53 = vld [vmem:[%s5261_s0 + $0x38] sm:$0xff]   ;;  %v3008_v55 = vld [vmem:[%s5259_s1 + $0x190] sm:$0xff] }
  0x13   :  { %v3640_v54 = vld [vmem:[%s5261_s0 + $0x78] sm:$0xff]   ;;  %v3641_v57 = vld [vmem:[%s5261_s0 + $0x80] sm:$0xff]   ;;  %v3047_v59 = vld [vmem:[%s5259_s1 + $0x208] sm:$0xff] }
  0x14   :  { %3345 = vmatpush3.bf16.msra.mxu0 %v3796_v15  ;;  %3377 = vmatpush3.bf16.msra.mxu1 %v3796_v15  ;;  %v2969_v56 = vld [vmem:[%s5259_s1 + $0x118] sm:$0xff]  ;;  %v3642_v58 = vld [vmem:[%s5261_s0 + $0xc0] sm:$0xff]   ;;  %v3643_v61 = vld [vmem:[%s5261_s0 + $0x88] sm:$0xff]  }
  0x15   :  { %3346 = vmatprep.subr.bf16.mxu0 %v3819_v20  ;;  %3378 = vmatprep.subr.bf16.mxu1 %v3819_v20  ;;  %v3046_v60 = vld [vmem:[%s5259_s1 + $0x200] sm:$0xff]  ;;  %v3644_v62 = vld [vmem:[%s5261_s0 + $0xc8] sm:$0xff]   ;;  %v3009_v63 = vld [vmem:[%s5259_s1 + $0x198] sm:$0xff] }
  0x16   :  { %354 = vperm.xlu1 %3616, %v61_v18   ;;  %349 = vperm.xlu0 %3615, %v60_v19   ;;  %v2970_v0 = vld [vmem:[%s5259_s1 + $0x120] sm:$0xff]  ;;  %v3645_v1 = vld [vmem:[%s5261_s0 + $0x90] sm:$0xff]   ;;  %v3647_v7 = vld [vmem:[%s5261_s0 + $0x98] sm:$0xff]  }
  0x17   :  { %v3646_v2 = vld [vmem:[%s5261_s0 + $0xd0] sm:$0xff]   ;;  %v3086_v4 = vld [vmem:[%s5259_s1 + $0x280] sm:$0xff]  ;;  %v3648_v8 = vld [vmem:[%s5261_s0 + $0xd8] sm:$0xff]  }
  0x18   :  { %3347 = vmatpush3.bf16.msra.mxu0 %v3819_v20  ;;  %3379 = vmatpush3.bf16.msra.mxu1 %v3819_v20  ;;  %v3048_v5 = vld [vmem:[%s5259_s1 + $0x210] sm:$0xff]  ;;  %v2971_v10 = vld [vmem:[%s5259_s1 + $0x128] sm:$0xff]  ;;  %v3649_v13 = vld [vmem:[%s5261_s0 + $0xa0] sm:$0xff]  }
  0x19   :  { %3348 = vmatprep.subr.bf16.mxu0 %v3834_v23  ;;  %3380 = vmatprep.subr.bf16.mxu1 %v3834_v23  ;;  %v3087_v11 = vld [vmem:[%s5259_s1 + $0x288] sm:$0xff]  ;;  %v3650_v14 = vld [vmem:[%s5261_s0 + $0xe0] sm:$0xff]   ;;  %v3049_v16 = vld [vmem:[%s5259_s1 + $0x218] sm:$0xff] }
  0x1a   :  { %364 = vperm.xlu1 %3616, %v63_v21   ;;  %359 = vperm.xlu0 %3615, %v62_v22   ;;  %v3010_v17 = vld [vmem:[%s5259_s1 + $0x1a0] sm:$0xff]  ;;  %v3651_v18 = vld [vmem:[%s5261_s0 + $0xa8] sm:$0xff]   ;;  %v3088_v22 = vld [vmem:[%s5259_s1 + $0x290] sm:$0xff] }
  0x1b   :  { %v3652_v19 = vld [vmem:[%s5261_s0 + $0xe8] sm:$0xff]   ;;  %v3126_v21 = vld [vmem:[%s5259_s1 + $0x300] sm:$0xff] }
  0x1c   :  { %3349 = vmatpush3.bf16.msra.mxu0 %v3834_v23  ;;  %3381 = vmatpush3.bf16.msra.mxu1 %v3834_v23 }
  0x1d   :  { %3350 = vmatprep.subr.bf16.mxu0 %v3849_v26  ;;  %3382 = vmatprep.subr.bf16.mxu1 %v3849_v26 }
  0x1e   :  { %374 = vperm.xlu1 %3616, %v65_v24   ;;  %369 = vperm.xlu0 %3615, %v64_v25   ;;  %v3653_v24 = vld [vmem:[%s5261_s0 + $0xb0] sm:$0xff]  }
  0x1f   :  { %v3654_v25 = vld [vmem:[%s5261_s0 + $0xf0] sm:$0xff]  }
  0x20   :  { %3351 = vmatpush3.bf16.msra.mxu0 %v3849_v26  ;;  %3383 = vmatpush3.bf16.msra.mxu1 %v3849_v26 }
  0x21   :  { %3400 = vmatprep.subr.bf16.mxu0 %v3740_v3  ;;  %3432 = vmatprep.subr.bf16.mxu1 %v3740_v3 }
  0x22   :  { %639 = vperm.xlu1 %3616, %v2927_v27   ;;  %634 = vperm.xlu0 %3615, %v2926_v28   ;;  %v2972_v27 = vld [vmem:[%s5259_s1 + $0x130] sm:$0xff]  ;;  %v3127_v28 = vld [vmem:[%s5259_s1 + $0x308] sm:$0xff] }
  0x23   :  { %3353 = vmatmul.mubr.bf16.vlgmr.msra.gmra.mrb[0].mxu0 %v3627_v29  ;;  %3385 = vmatmul.mubr.bf16.vlgmr.msra.gmra.mrb[0].mxu1 %v3628_v30  ;;  %v3655_v29 = vld [vmem:[%s5261_s0 + $0xb8] sm:$0xff]  }
  0x24   :  { %3401 = vmatpush3.bf16.msra.mxu0 %v3740_v3  ;;  %3433 = vmatpush3.bf16.msra.mxu1 %v3740_v3  ;;  %v3656_v30 = vld [vmem:[%s5261_s0 + $0xf8] sm:$0xff]  }
  0x25   :  { %3402 = vmatprep.subr.bf16.mxu0 %v3753_v6  ;;  %3434 = vmatprep.subr.bf16.mxu1 %v3753_v6 }
  0x26   :  { %649 = vperm.xlu1 %3616, %v2929_v31   ;;  %644 = vperm.xlu0 %3615, %v2928_v32   ;;  %v3050_v31 = vld [vmem:[%s5259_s1 + $0x220] sm:$0xff]  ;;  %v3011_v32 = vld [vmem:[%s5259_s1 + $0x1a8] sm:$0xff] }
  0x27   :  { %3356 = vmatprep.mubr.bf16.mxu0 %v3629_v33  ;;  %3388 = vmatprep.mubr.bf16.mxu1 %v3630_v34  ;;  %v3657_v33 = vld [vmem:[%s5261_s0 + $0x100] sm:$0xff]  }
  0x28   :  { %3403 = vmatpush3.bf16.msra.mxu0 %v3753_v6  ;;  %3435 = vmatpush3.bf16.msra.mxu1 %v3753_v6  ;;  %v3658_v34 = vld [vmem:[%s5261_s0 + $0x140] sm:$0xff]  }
  0x29   :  { %3404 = vmatprep.subr.bf16.mxu0 %v3768_v9  ;;  %3436 = vmatprep.subr.bf16.mxu1 %v3768_v9 }
  0x2a   :  { %659 = vperm.xlu1 %3616, %v2931_v35   ;;  %654 = vperm.xlu0 %3615, %v2930_v36   ;;  %v3128_v35 = vld [vmem:[%s5259_s1 + $0x310] sm:$0xff]  ;;  %v3089_v36 = vld [vmem:[%s5259_s1 + $0x298] sm:$0xff] }
  0x2b   :  { %3357 = vmatmul.mubr.bf16.gmra.mrb[4].mxu0 %v3631_v37  ;;  %3389 = vmatmul.mubr.bf16.gmra.mrb[4].mxu1 %v3632_v38  ;;  %v3659_v37 = vld [vmem:[%s5261_s0 + $0x108] sm:$0xff]  }
  0x2c   :  { %3405 = vmatpush3.bf16.msra.mxu0 %v3768_v9  ;;  %3437 = vmatpush3.bf16.msra.mxu1 %v3768_v9  ;;  %v3660_v38 = vld [vmem:[%s5261_s0 + $0x148] sm:$0xff]  }
  0x2d   :  { %3406 = vmatprep.subr.bf16.mxu0 %v3783_v12  ;;  %3438 = vmatprep.subr.bf16.mxu1 %v3783_v12 }
  0x2e   :  { %669 = vperm.xlu1 %3616, %v2933_v39   ;;  %664 = vperm.xlu0 %3615, %v2932_v40   ;;  %v3167_v39 = vld [vmem:[%s5259_s1 + $0x388] sm:$0xff]  ;;  %v3166_v40 = vld [vmem:[%s5259_s1 + $0x380] sm:$0xff] }
  0x2f   :  { %3360 = vmatprep.mubr.bf16.mxu0 %v3633_v41  ;;  %3392 = vmatprep.mubr.bf16.mxu1 %v3634_v42  ;;  %v3661_v41 = vld [vmem:[%s5261_s0 + $0x110] sm:$0xff]  }
  0x30   :  { %3407 = vmatpush3.bf16.msra.mxu0 %v3783_v12  ;;  %3439 = vmatpush3.bf16.msra.mxu1 %v3783_v12  ;;  %v3662_v42 = vld [vmem:[%s5261_s0 + $0x150] sm:$0xff]  }
  0x31   :  { %3408 = vmatprep.subr.bf16.mxu0 %v3796_v15  ;;  %3440 = vmatprep.subr.bf16.mxu1 %v3796_v15 }
  0x32   :  { %969 = vperm.xlu1 %3616, %v2966_v43   ;;  %674 = vperm.xlu0 %3615, %v2934_v44   ;;  %v3012_v43 = vld [vmem:[%s5259_s1 + $0x1b0] sm:$0xff]  ;;  %v2973_v44 = vld [vmem:[%s5259_s1 + $0x138] sm:$0xff] }
  0x33   :  { %3361 = vmatmul.mubr.bf16.gmra.mrb[8].mxu0 %v3635_v45  ;;  %3393 = vmatmul.mubr.bf16.gmra.mrb[8].mxu1 %v3636_v46  ;;  %v3664_v45 = vld [vmem:[%s5261_s0 + $0x158] sm:$0xff]   ;;  %v3090_v46 = vld [vmem:[%s5259_s1 + $0x2a0] sm:$0xff] }
  0x34   :  { %3409 = vmatpush3.bf16.msra.mxu0 %v3796_v15  ;;  %3441 = vmatpush3.bf16.msra.mxu1 %v3796_v15 }
  0x35   :  { %3410 = vmatprep.subr.bf16.mxu0 %v3819_v20  ;;  %3442 = vmatprep.subr.bf16.mxu1 %v3819_v20 }
  0x36   :  { %979 = vperm.xlu1 %3616, %v2968_v47   ;;  %974 = vperm.xlu0 %3615, %v2967_v48   ;;  %v3051_v47 = vld [vmem:[%s5259_s1 + $0x228] sm:$0xff]  ;;  %v3666_v48 = vld [vmem:[%s5261_s0 + $0x160] sm:$0xff]  }
  0x37   :  { %3364 = vmatprep.mubr.bf16.mxu0 %v3637_v49  ;;  %3396 = vmatprep.mubr.bf16.mxu1 %v3638_v50  ;;  %v3168_v49 = vld [vmem:[%s5259_s1 + $0x390] sm:$0xff]  ;;  %v3129_v50 = vld [vmem:[%s5259_s1 + $0x318] sm:$0xff] }
  0x38   :  { %3411 = vmatpush3.bf16.msra.mxu0 %v3819_v20  ;;  %3443 = vmatpush3.bf16.msra.mxu1 %v3819_v20 }
  0x39   :  { %3412 = vmatprep.subr.bf16.mxu0 %v3834_v23  ;;  %3444 = vmatprep.subr.bf16.mxu1 %v3834_v23 }
  0x3a   :  { %1309 = vperm.xlu1 %3616, %v3007_v51   ;;  %1304 = vperm.xlu0 %3615, %v3006_v52   ;;  %v3668_v51 = vld [vmem:[%s5261_s0 + $0x168] sm:$0xff]   ;;  %v2974_v52 = vld [vmem:[%s5259_s1 + $0x140] sm:$0xff] }
  0x3b   :  { %3365 = vmatmul.mubr.bf16.gmra.mrb[12].mxu0 %v3639_v53  ;;  %3397 = vmatmul.mubr.bf16.gmra.mrb[12].mxu1 %v3640_v54  ;;  %v2935_v53 = vld [vmem:[%s5259_s1 + $0xc8] sm:$0xff]  ;;  %v3670_v54 = vld [vmem:[%s5261_s0 + $0x170] sm:$0xff]  }
  0x3c   :  { %3413 = vmatpush3.bf16.msra.mxu0 %v3834_v23  ;;  %3445 = vmatpush3.bf16.msra.mxu1 %v3834_v23 }
  0x3d   :  { %3414 = vmatprep.subr.bf16.mxu0 %v3849_v26  ;;  %3446 = vmatprep.subr.bf16.mxu1 %v3849_v26 }
  0x3e   :  { %1314 = vperm.xlu1 %3616, %v3008_v55   ;;  %984 = vperm.xlu0 %3615, %v2969_v56   ;;  %v3052_v55 = vld [vmem:[%s5259_s1 + $0x230] sm:$0xff]  ;;  %v3013_v56 = vld [vmem:[%s5259_s1 + $0x1b8] sm:$0xff] }
  0x3f   :  { %3416 = vmatprep.mubr.bf16.mxu0 %v3641_v57  ;;  %3448 = vmatprep.mubr.bf16.mxu1 %v3642_v58  ;;  %v3672_v57 = vld [vmem:[%s5261_s0 + $0x178] sm:$0xff]   ;;  %v3130_v58 = vld [vmem:[%s5259_s1 + $0x320] sm:$0xff] }
  0x40   :  { %3415 = vmatpush3.bf16.msra.mxu0 %v3849_v26  ;;  %3447 = vmatpush3.bf16.msra.mxu1 %v3849_v26 }
  0x41   :  { %3464 = vmatprep.subr.bf16.mxu0 %v3740_v3  ;;  %3496 = vmatprep.subr.bf16.mxu1 %v3740_v3 }
  0x42   :  { %1644 = vperm.xlu1 %3616, %v3047_v59   ;;  %1639 = vperm.xlu0 %3615, %v3046_v60   ;;  %v3091_v59 = vld [vmem:[%s5259_s1 + $0x2a8] sm:$0xff]  ;;  %v3674_v60 = vld [vmem:[%s5261_s0 + $0x1c0] sm:$0xff]  }
  0x43   :  { %3417 = vmatmul.mubr.bf16.vlgmr.msra.gmra.mrb[16].mxu0 %v3643_v61  ;;  %3449 = vmatmul.mubr.bf16.vlgmr.msra.gmra.mrb[16].mxu1 %v3644_v62  ;;  %v2936_v61 = vld [vmem:[%s5259_s1 + $0xd0] sm:$0xff]  ;;  %v3169_v62 = vld [vmem:[%s5259_s1 + $0x398] sm:$0xff] }
  0x44   :  { %3465 = vmatpush3.bf16.msra.mxu0 %v3740_v3  ;;  %3497 = vmatpush3.bf16.msra.mxu1 %v3740_v3 }
  0x45   :  { %3466 = vmatprep.subr.bf16.mxu0 %v3753_v6  ;;  %3498 = vmatprep.subr.bf16.mxu1 %v3753_v6 }
  0x46   :  { %1319 = vperm.xlu1 %3616, %v3009_v63   ;;  %989 = vperm.xlu0 %3615, %v2970_v0   ;;  %v3676_v63 = vld [vmem:[%s5261_s0 + $0x1c8] sm:$0xff]  }
  0x47   :  { %3420 = vmatprep.mubr.bf16.mxu0 %v3645_v1  ;;  %3452 = vmatprep.mubr.bf16.mxu1 %v3646_v2  ;;  %v3677_v2 = vld [vmem:[%s5261_s0 + $0x190] sm:$0xff]  }
  0x48   :  { %3467 = vmatpush3.bf16.msra.mxu0 %v3753_v6  ;;  %3499 = vmatpush3.bf16.msra.mxu1 %v3753_v6 }
  0x49   :  { %3468 = vmatprep.subr.bf16.mxu0 %v3768_v9  ;;  %3500 = vmatprep.subr.bf16.mxu1 %v3768_v9 }
  0x4a   :  { %1974 = vperm.xlu1 %3616, %v3086_v4   ;;  %1649 = vperm.xlu0 %3615, %v3048_v5   ;;  %v3678_v4 = vld [vmem:[%s5261_s0 + $0x1d0] sm:$0xff]   ;;  %v3014_v5 = vld [vmem:[%s5259_s1 + $0x1c0] sm:$0xff] }
  0x4b   :  { %3421 = vmatmul.mubr.bf16.gmra.mrb[20].mxu0 %v3647_v7  ;;  %3453 = vmatmul.mubr.bf16.gmra.mrb[20].mxu1 %v3648_v8  ;;  %v2975_v7 = vld [vmem:[%s5259_s1 + $0x148] sm:$0xff] }
  0x4c   :  { %3469 = vmatpush3.bf16.msra.mxu0 %v3768_v9  ;;  %3501 = vmatpush3.bf16.msra.mxu1 %v3768_v9 }
  0x4d   :  { %3470 = vmatprep.subr.bf16.mxu0 %v3783_v12  ;;  %3502 = vmatprep.subr.bf16.mxu1 %v3783_v12 }
  0x4e   :  { %994 = vperm.xlu1 %3616, %v2971_v10   ;;  %1979 = vperm.xlu0 %3615, %v3087_v11   ;;  %v3092_v10 = vld [vmem:[%s5259_s1 + $0x2b0] sm:$0xff]  ;;  %v3053_v11 = vld [vmem:[%s5259_s1 + $0x238] sm:$0xff] }
  0x4f   :  { %3424 = vmatprep.mubr.bf16.mxu0 %v3649_v13  ;;  %3456 = vmatprep.mubr.bf16.mxu1 %v3650_v14  ;;  %v3679_v13 = vld [vmem:[%s5261_s0 + $0x198] sm:$0xff]  }
  0x50   :  { %3471 = vmatpush3.bf16.msra.mxu0 %v3783_v12  ;;  %3503 = vmatpush3.bf16.msra.mxu1 %v3783_v12  ;;  %v3680_v14 = vld [vmem:[%s5261_s0 + $0x1d8] sm:$0xff]  }
  0x51   :  { %3472 = vmatprep.subr.bf16.mxu0 %v3796_v15  ;;  %3504 = vmatprep.subr.bf16.mxu1 %v3796_v15 }
  0x52   :  { %1654 = vperm.xlu1 %3616, %v3049_v16   ;;  %1324 = vperm.xlu0 %3615, %v3010_v17  }
  0x53   :  { %3425 = vmatmul.mubr.bf16.gmra.mrb[24].mxu0 %v3651_v18  ;;  %3457 = vmatmul.mubr.bf16.gmra.mrb[24].mxu1 %v3652_v19  ;;  %v3681_v18 = vld [vmem:[%s5261_s0 + $0x1a0] sm:$0xff]  }
  0x54   :  { %3473 = vmatpush3.bf16.msra.mxu0 %v3796_v15  ;;  %3505 = vmatpush3.bf16.msra.mxu1 %v3796_v15  ;;  %v3682_v19 = vld [vmem:[%s5261_s0 + $0x1e0] sm:$0xff]  }
  0x55   :  { %3474 = vmatprep.subr.bf16.mxu0 %v3819_v20  ;;  %3506 = vmatprep.subr.bf16.mxu1 %v3819_v20 }
  0x56   :  { %2309 = vperm.xlu1 %3616, %v3126_v21   ;;  %1984 = vperm.xlu0 %3615, %v3088_v22   ;;  %v3170_v21 = vld [vmem:[%s5259_s1 + $0x3a0] sm:$0xff]  ;;  %v3131_v22 = vld [vmem:[%s5259_s1 + $0x328] sm:$0xff] }
  0x57   :  { %3428 = vmatprep.mubr.bf16.mxu0 %v3653_v24  ;;  %3460 = vmatprep.mubr.bf16.mxu1 %v3654_v25 }
  0x58   :  { %3475 = vmatpush3.bf16.msra.mxu0 %v3819_v20  ;;  %3507 = vmatpush3.bf16.msra.mxu1 %v3819_v20 }
  0x59   :  { %3476 = vmatprep.subr.bf16.mxu0 %v3834_v23  ;;  %3508 = vmatprep.subr.bf16.mxu1 %v3834_v23 }
  0x5a   :  { %999 = vperm.xlu1 %3616, %v2972_v27   ;;  %2314 = vperm.xlu0 %3615, %v3127_v28   ;;  %v2976_v27 = vld [vmem:[%s5259_s1 + $0x150] sm:$0xff]  ;;  %v2937_v28 = vld [vmem:[%s5259_s1 + $0xd8] sm:$0xff] }
  0x5b   :  { %3429 = vmatmul.mubr.bf16.gmra.mrb[28].mxu0 %v3655_v29  ;;  %3461 = vmatmul.mubr.bf16.gmra.mrb[28].mxu1 %v3656_v30  ;;  %v3683_v29 = vld [vmem:[%s5261_s0 + $0x1a8] sm:$0xff]  }
  0x5c   :  { %3477 = vmatpush3.bf16.msra.mxu0 %v3834_v23  ;;  %3509 = vmatpush3.bf16.msra.mxu1 %v3834_v23  ;;  %v3684_v30 = vld [vmem:[%s5261_s0 + $0x1e8] sm:$0xff]  }
  0x5d   :  { %3478 = vmatprep.subr.bf16.mxu0 %v3849_v26  ;;  %3510 = vmatprep.subr.bf16.mxu1 %v3849_v26 }
  0x5e   :  { %1659 = vperm.xlu1 %3616, %v3050_v31   ;;  %1329 = vperm.xlu0 %3615, %v3011_v32  }
  0x5f   :  { %3480 = vmatprep.mubr.bf16.mxu0 %v3657_v33  ;;  %3512 = vmatprep.mubr.bf16.mxu1 %v3658_v34  ;;  %v3685_v33 = vld [vmem:[%s5261_s0 + $0x1b0] sm:$0xff]  }
  0x60   :  { %3479 = vmatpush3.bf16.msra.mxu0 %v3849_v26  ;;  %3511 = vmatpush3.bf16.msra.mxu1 %v3849_v26  ;;  %v3686_v34 = vld [vmem:[%s5261_s0 + $0x1f0] sm:$0xff]  }
  0x61   :  { %3528 = vmatprep.subr.bf16.mxu0 %v3740_v3  ;;  %3560 = vmatprep.subr.bf16.mxu1 %v3740_v3 }
  0x62   :  { %2319 = vperm.xlu1 %3616, %v3128_v35   ;;  %1989 = vperm.xlu0 %3615, %v3089_v36   ;;  %v3054_v35 = vld [vmem:[%s5259_s1 + $0x240] sm:$0xff]  ;;  %v3015_v36 = vld [vmem:[%s5259_s1 + $0x1c8] sm:$0xff] }
  0x63   :  { %3481 = vmatmul.mubr.bf16.vlgmr.msra.gmra.mrb[32].mxu0 %v3659_v37  ;;  %3513 = vmatmul.mubr.bf16.vlgmr.msra.gmra.mrb[32].mxu1 %v3660_v38 }
  0x64   :  { %3529 = vmatpush3.bf16.msra.mxu0 %v3740_v3  ;;  %3561 = vmatpush3.bf16.msra.mxu1 %v3740_v3  ;;  %v3663_v3 = vld [vmem:[%s5261_s0 + $0x118] sm:$0xff]  }
  0x65   :  { %3530 = vmatprep.subr.bf16.mxu0 %v3753_v6  ;;  %3562 = vmatprep.subr.bf16.mxu1 %v3753_v6 }
  0x66   :  { %2649 = vperm.xlu1 %3616, %v3167_v39   ;;  %2644 = vperm.xlu0 %3615, %v3166_v40   ;;  %v3132_v39 = vld [vmem:[%s5259_s1 + $0x330] sm:$0xff]  ;;  %v3093_v40 = vld [vmem:[%s5259_s1 + $0x2b8] sm:$0xff] }
  0x67   :  { %3484 = vmatprep.mubr.bf16.mxu0 %v3661_v41  ;;  %3516 = vmatprep.mubr.bf16.mxu1 %v3662_v42  ;;  %v3687_v41 = vld [vmem:[%s5261_s0 + $0x1b8] sm:$0xff]  }
  0x68   :  { %3531 = vmatpush3.bf16.msra.mxu0 %v3753_v6  ;;  %3563 = vmatpush3.bf16.msra.mxu1 %v3753_v6  ;;  %v3665_v6 = vld [vmem:[%s5261_s0 + $0x120] sm:$0xff]   ;;  %v3688_v42 = vld [vmem:[%s5261_s0 + $0x1f8] sm:$0xff]  }
  0x69   :  { %3532 = vmatprep.subr.bf16.mxu0 %v3768_v9  ;;  %3564 = vmatprep.subr.bf16.mxu1 %v3768_v9 }
  0x6a   :  { %1334 = vperm.xlu1 %3616, %v3012_v43   ;;  %1004 = vperm.xlu0 %3615, %v2973_v44  }
  0x6b   :  { %3485 = vmatmul.mubr.bf16.gmra.mrb[36].mxu0 %v3663_v3  ;;  %3517 = vmatmul.mubr.bf16.gmra.mrb[36].mxu1 %v3664_v45  ;;  %v2938_v3 = vld [vmem:[%s5259_s1 + $0xe0] sm:$0xff]  ;;  %v3171_v45 = vld [vmem:[%s5259_s1 + $0x3a8] sm:$0xff] }
  0x6c   :  { %3533 = vmatpush3.bf16.msra.mxu0 %v3768_v9  ;;  %3565 = vmatpush3.bf16.msra.mxu1 %v3768_v9  ;;  %v3667_v9 = vld [vmem:[%s5261_s0 + $0x128] sm:$0xff]  }
  0x6d   :  { %3534 = vmatprep.subr.bf16.mxu0 %v3783_v12  ;;  %3566 = vmatprep.subr.bf16.mxu1 %v3783_v12 }
  0x6e   :  { %1994 = vperm.xlu1 %3616, %v3090_v46   ;;  %1664 = vperm.xlu0 %3615, %v3051_v47  }
  0x6f   :  { %3488 = vmatprep.mubr.bf16.mxu0 %v3665_v6  ;;  %3520 = vmatprep.mubr.bf16.mxu1 %v3666_v48  ;;  %v3016_v6 = vld [vmem:[%s5259_s1 + $0x1d0] sm:$0xff]  ;;  %v2977_v48 = vld [vmem:[%s5259_s1 + $0x158] sm:$0xff] }
  0x70   :  { %3535 = vmatpush3.bf16.msra.mxu0 %v3783_v12  ;;  %3567 = vmatpush3.bf16.msra.mxu1 %v3783_v12  ;;  %v3669_v12 = vld [vmem:[%s5261_s0 + $0x130] sm:$0xff]  }
  0x71   :  { %3536 = vmatprep.subr.bf16.mxu0 %v3796_v15  ;;  %3568 = vmatprep.subr.bf16.mxu1 %v3796_v15 }
  0x72   :  { %2654 = vperm.xlu1 %3616, %v3168_v49   ;;  %2324 = vperm.xlu0 %3615, %v3129_v50  }
  0x73   :  { %3489 = vmatmul.mubr.bf16.gmra.mrb[40].mxu0 %v3667_v9  ;;  %3521 = vmatmul.mubr.bf16.gmra.mrb[40].mxu1 %v3668_v51  ;;  %v3094_v9 = vld [vmem:[%s5259_s1 + $0x2c0] sm:$0xff]  ;;  %v3055_v51 = vld [vmem:[%s5259_s1 + $0x248] sm:$0xff] }
  0x74   :  { %3537 = vmatpush3.bf16.msra.mxu0 %v3796_v15  ;;  %3569 = vmatpush3.bf16.msra.mxu1 %v3796_v15  ;;  %v3671_v15 = vld [vmem:[%s5261_s0 + $0x138] sm:$0xff]  }
  0x75   :  { %3538 = vmatprep.subr.bf16.mxu0 %v3819_v20  ;;  %3570 = vmatprep.subr.bf16.mxu1 %v3819_v20 }
  0x76   :  { %1009 = vperm.xlu1 %3616, %v2974_v52   ;;  %679 = vperm.xlu0 %3615, %v2935_v53  }
  0x77   :  { %3492 = vmatprep.mubr.bf16.mxu0 %v3669_v12  ;;  %3524 = vmatprep.mubr.bf16.mxu1 %v3670_v54  ;;  %v3172_v12 = vld [vmem:[%s5259_s1 + $0x3b0] sm:$0xff]  ;;  %v3133_v54 = vld [vmem:[%s5259_s1 + $0x338] sm:$0xff] }
  0x78   :  { %3539 = vmatpush3.bf16.msra.mxu0 %v3819_v20  ;;  %3571 = vmatpush3.bf16.msra.mxu1 %v3819_v20  ;;  %v3673_v20 = vld [vmem:[%s5261_s0 + $0x180] sm:$0xff]  }
  0x79   :  { %3540 = vmatprep.subr.bf16.mxu0 %v3834_v23  ;;  %3572 = vmatprep.subr.bf16.mxu1 %v3834_v23 }
  0x7a   :  { %1669 = vperm.xlu1 %3616, %v3052_v55   ;;  %1339 = vperm.xlu0 %3615, %v3013_v56  }
  0x7b   :  { %3493 = vmatmul.mubr.bf16.gmra.mrb[44].mxu0 %v3671_v15  ;;  %3525 = vmatmul.mubr.bf16.gmra.mrb[44].mxu1 %v3672_v57  ;;  %v2978_v15 = vld [vmem:[%s5259_s1 + $0x160] sm:$0xff]  ;;  %v2939_v57 = vld [vmem:[%s5259_s1 + $0xe8] sm:$0xff] }
  0x7c   :  { %3541 = vmatpush3.bf16.msra.mxu0 %v3834_v23  ;;  %3573 = vmatpush3.bf16.msra.mxu1 %v3834_v23  ;;  %v3675_v23 = vld [vmem:[%s5261_s0 + $0x188] sm:$0xff]  }
  0x7d   :  { %3542 = vmatprep.subr.bf16.mxu0 %v3849_v26  ;;  %3574 = vmatprep.subr.bf16.mxu1 %v3849_v26 }
  0x7e   :  { %2329 = vperm.xlu1 %3616, %v3130_v58   ;;  %1999 = vperm.xlu0 %3615, %v3091_v59  }
  0x7f   :  { %3544 = vmatprep.mubr.bf16.mxu0 %v3673_v20  ;;  %3576 = vmatprep.mubr.bf16.mxu1 %v3674_v60  ;;  %v3056_v20 = vld [vmem:[%s5259_s1 + $0x250] sm:$0xff]  ;;  %v3017_v60 = vld [vmem:[%s5259_s1 + $0x1d8] sm:$0xff] }
  0x80   :  { %3543 = vmatpush3.bf16.msra.mxu0 %v3849_v26  ;;  %3575 = vmatpush3.bf16.msra.mxu1 %v3849_v26 }
  0x81   :  { %v4251_v0 = vpop.permute.xlu1 %309  ;;  %v4253_v1 = vpop.permute.xlu0 %299 }
  0x82   :  { %684 = vperm.xlu1 %3616, %v2936_v61   ;;  %2659 = vperm.xlu0 %3615, %v3169_v62  }
  0x83   :  { %3545 = vmatmul.mubr.bf16.vlgmr.msra.gmra.mrb[48].mxu0 %v3675_v23  ;;  %3577 = vmatmul.mubr.bf16.vlgmr.msra.gmra.mrb[48].mxu1 %v3676_v63  ;;  %v3134_v23 = vld [vmem:[%s5259_s1 + $0x340] sm:$0xff]  ;;  %v3095_v63 = vld [vmem:[%s5259_s1 + $0x2c8] sm:$0xff] }
  0x84   :  { %3548 = vmatprep.mubr.bf16.mxu0 %v3677_v2  ;;  %3580 = vmatprep.mubr.bf16.mxu1 %v3678_v4 }
  0x85   :  { %v4269_v26 = vpop.permute.xlu1 %314  ;;  %v4271_v8 = vpop.permute.xlu0 %304 }
  0x86   :  { %1344 = vperm.xlu1 %3616, %v3014_v5   ;;  %1014 = vperm.xlu0 %3615, %v2975_v7   ;;  %v2940_v5 = vld [vmem:[%s5259_s1 + $0xf0] sm:$0xff]  ;;  %v3173_v7 = vld [vmem:[%s5259_s1 + $0x3b8] sm:$0xff] }
  0x89   :  { %v4285_v16 = vpop.permute.xlu1 %324  ;;  %v4287_v17 = vpop.permute.xlu0 %319 }
  0x8a   :  { %2004 = vperm.xlu1 %3616, %v3092_v10   ;;  %1674 = vperm.xlu0 %3615, %v3053_v11  }
  0x8b   :  { %3549 = vmatmul.mubr.bf16.gmra.mrb[52].mxu0 %v3679_v13  ;;  %3581 = vmatmul.mubr.bf16.gmra.mrb[52].mxu1 %v3680_v14  ;;  %v3018_v13 = vld [vmem:[%s5259_s1 + $0x1e0] sm:$0xff]  ;;  %v2979_v14 = vld [vmem:[%s5259_s1 + $0x168] sm:$0xff] }
  0x8c   :  { %3552 = vmatprep.mubr.bf16.mxu0 %v3681_v18  ;;  %3584 = vmatprep.mubr.bf16.mxu1 %v3682_v19 }
  0x8d   :  { %v4301_v24 = vpop.permute.xlu1 %334  ;;  %v4303_v25 = vpop.permute.xlu0 %329 }
  0x8e   :  { %2664 = vperm.xlu1 %3616, %v3170_v21   ;;  %2334 = vperm.xlu0 %3615, %v3131_v22   ;;  %v3096_v21 = vld [vmem:[%s5259_s1 + $0x2d0] sm:$0xff]  ;;  %v3057_v22 = vld [vmem:[%s5259_s1 + $0x258] sm:$0xff] }
  0x91   :  { %v4317_v31 = vpop.permute.xlu1 %344  ;;  %v4319_v32 = vpop.permute.xlu0 %339 }
  0x92   :  { %1019 = vperm.xlu1 %3616, %v2976_v27   ;;  %689 = vperm.xlu0 %3615, %v2937_v28  }
  0x93   :  { %3553 = vmatmul.mubr.bf16.gmra.mrb[56].mxu0 %v3683_v29  ;;  %3585 = vmatmul.mubr.bf16.gmra.mrb[56].mxu1 %v3684_v30  ;;  %v3174_v29 = vld [vmem:[%s5259_s1 + $0x3c0] sm:$0xff]  ;;  %v3135_v30 = vld [vmem:[%s5259_s1 + $0x348] sm:$0xff] }
  0x94   :  { %3556 = vmatprep.mubr.bf16.mxu0 %v3685_v33  ;;  %3588 = vmatprep.mubr.bf16.mxu1 %v3686_v34 }
  0x95   :  { %v4333_v37 = vpop.permute.xlu1 %354  ;;  %v4335_v38 = vpop.permute.xlu0 %349 }
  0x96   :  { %1679 = vperm.xlu1 %3616, %v3054_v35   ;;  %1349 = vperm.xlu0 %3615, %v3015_v36   ;;  %v2980_v35 = vld [vmem:[%s5259_s1 + $0x170] sm:$0xff]  ;;  %v2941_v36 = vld [vmem:[%s5259_s1 + $0xf8] sm:$0xff] }
  0x99   :  { %v4349_v43 = vpop.permute.xlu1 %364  ;;  %v4351_v44 = vpop.permute.xlu0 %359 }
  0x9a   :  { %2339 = vperm.xlu1 %3616, %v3132_v39   ;;  %2009 = vperm.xlu0 %3615, %v3093_v40  }
  0x9b   :  { %3557 = vmatmul.mubr.bf16.gmra.mrb[60].mxu0 %v3687_v41  ;;  %3589 = vmatmul.mubr.bf16.gmra.mrb[60].mxu1 %v3688_v42  ;;  %v3058_v41 = vld [vmem:[%s5259_s1 + $0x260] sm:$0xff]  ;;  %v3019_v42 = vld [vmem:[%s5259_s1 + $0x1e8] sm:$0xff] }
  0x9d   :  { %v4359_v46 = vpop.permute.xlu1 %374  ;;  %v4361_v47 = vpop.permute.xlu0 %369 }
  0x9e   :  { %694 = vperm.xlu1 %3616, %v2938_v3   ;;  %2669 = vperm.xlu0 %3615, %v3171_v45  }
  0xa1   :  { %v4369_v49 = vpop.permute.xlu1 %639  ;;  %v4371_v50 = vpop.permute.xlu0 %634 }
  0xa2   :  { %1354 = vperm.xlu1 %3616, %v3016_v6   ;;  %1024 = vperm.xlu0 %3615, %v2977_v48   ;;  %v3136_v6 = vld [vmem:[%s5259_s1 + $0x350] sm:$0xff]  ;;  %v3097_v48 = vld [vmem:[%s5259_s1 + $0x2d8] sm:$0xff] }
  0xa5   :  { %v4379_v52 = vpop.permute.xlu1 %649  ;;  %v4381_v53 = vpop.permute.xlu0 %644 }
  0xa6   :  { %2014 = vperm.xlu1 %3616, %v3094_v9   ;;  %1684 = vperm.xlu0 %3615, %v3055_v51  }
  0xa9   :  { %v4389_v55 = vpop.permute.xlu1 %659  ;;  %v4391_v56 = vpop.permute.xlu0 %654 }
  0xaa   :  { %2674 = vperm.xlu1 %3616, %v3172_v12   ;;  %2344 = vperm.xlu0 %3615, %v3133_v54   ;;  %v2981_v12 = vld [vmem:[%s5259_s1 + $0x178] sm:$0xff]  ;;  %v3175_v54 = vld [vmem:[%s5259_s1 + $0x3c8] sm:$0xff] }
  0xad   :  { %v4399_v58 = vpop.permute.xlu1 %669  ;;  %v4401_v59 = vpop.permute.xlu0 %664 }
  0xae   :  { %1029 = vperm.xlu1 %3616, %v2978_v15   ;;  %699 = vperm.xlu0 %3615, %v2939_v57  }
  0xb1   :  { %v4409_v61 = vpop.permute.xlu1 %969  ;;  %v4411_v62 = vpop.permute.xlu0 %674 }
  0xb2   :  { %1689 = vperm.xlu1 %3616, %v3056_v20   ;;  %1359 = vperm.xlu0 %3615, %v3017_v60   ;;  %v3059_v20 = vld [vmem:[%s5259_s1 + $0x268] sm:$0xff]  ;;  %v3020_v60 = vld [vmem:[%s5259_s1 + $0x1f0] sm:$0xff] }
  0xb5   :  { %v4419_v2 = vpop.permute.xlu1 %979  ;;  %v4421_v4 = vpop.permute.xlu0 %974 }
  0xb6   :  { %2349 = vperm.xlu1 %3616, %v3134_v23   ;;  %2019 = vperm.xlu0 %3615, %v3095_v63  }
  0xb9   :  { %v4429_v10 = vpop.permute.xlu1 %1309  ;;  %v4431_v11 = vpop.permute.xlu0 %1304 }
  0xba   :  { %704 = vperm.xlu1 %3616, %v2940_v5   ;;  %2679 = vperm.xlu0 %3615, %v3173_v7   ;;  %v3137_v5 = vld [vmem:[%s5259_s1 + $0x358] sm:$0xff]  ;;  %v3098_v7 = vld [vmem:[%s5259_s1 + $0x2e0] sm:$0xff] }
  0xbd   :  { %v4439_v18 = vpop.permute.xlu1 %1314  ;;  %v4441_v19 = vpop.permute.xlu0 %984 }
  0xbe   :  { %1364 = vperm.xlu1 %3616, %v3018_v13   ;;  %1034 = vperm.xlu0 %3615, %v2979_v14  }
  0xc1   :  { %v4449_v27 = vpop.permute.xlu1 %1644  ;;  %v4451_v28 = vpop.permute.xlu0 %1639 }
  0xc2   :  { %5302 = vst [vmem:[#allocation2_spill] sm:$0xff] %v4449_v27  ;;  %5303 = vst [vmem:[#allocation3_spill] sm:$0xff] %v4451_v28  ;;  %2024 = vperm.xlu1 %3616, %v3096_v21   ;;  %1694 = vperm.xlu0 %3615, %v3057_v22   ;;  %v3021_v21 = vld [vmem:[%s5259_s1 + $0x1f8] sm:$0xff]  ;;  %v3176_v22 = vld [vmem:[%s5259_s1 + $0x3d0] sm:$0xff] }
  0xc5   :  { %v4459_v33 = vpop.permute.xlu1 %1319  ;;  %v4461_v34 = vpop.permute.xlu0 %989 }
  0xc6   :  { %5304 = vst [vmem:[#allocation4_spill] sm:$0xff] %v4461_v34  ;;  %2684 = vperm.xlu1 %3616, %v3174_v29   ;;  %2354 = vperm.xlu0 %3615, %v3135_v30  }
  0xc9   :  { %v4469_v39 = vpop.permute.xlu1 %1974  ;;  %v4471_v40 = vpop.permute.xlu0 %1649 }
  0xca   :  { %5305 = vst [vmem:[#allocation5_spill] sm:$0xff] %v4469_v39  ;;  %5306 = vst [vmem:[#allocation6_spill] sm:$0xff] %v4471_v40  ;;  %1039 = vperm.xlu1 %3616, %v2980_v35   ;;  %709 = vperm.xlu0 %3615, %v2941_v36   ;;  %v3099_v35 = vld [vmem:[%s5259_s1 + $0x2e8] sm:$0xff]  ;;  %v3060_v36 = vld [vmem:[%s5259_s1 + $0x270] sm:$0xff] }
  0xcd   :  { %v4479_v3 = vpop.permute.xlu1 %994  ;;  %v4481_v45 = vpop.permute.xlu0 %1979 }
  0xce   :  { %5307 = vst [vmem:[#allocation7_spill] sm:$0xff] %v4479_v3  ;;  %5308 = vst [vmem:[#allocation8_spill] sm:$0xff] %v4481_v45  ;;  %1699 = vperm.xlu1 %3616, %v3058_v41   ;;  %1369 = vperm.xlu0 %3615, %v3019_v42  }
  0xd1   :  { %v4489_v9 = vpop.permute.xlu1 %1654  ;;  %v4491_v51 = vpop.permute.xlu0 %1324 }
  0xd2   :  { %5309 = vst [vmem:[#allocation9_spill] sm:$0xff] %v4489_v9  ;;  %5310 = vst [vmem:[#allocation10_spill] sm:$0xff] %v4491_v51  ;;  %2359 = vperm.xlu1 %3616, %v3136_v6   ;;  %2029 = vperm.xlu0 %3615, %v3097_v48   ;;  %v3177_v6 = vld [vmem:[%s5259_s1 + $0x3d8] sm:$0xff]  ;;  %v3138_v48 = vld [vmem:[%s5259_s1 + $0x360] sm:$0xff] }
  0xd5   :  { %v4499_v15 = vpop.permute.xlu1 %2309  ;;  %v4501_v57 = vpop.permute.xlu0 %1984 }
  0xd6   :  { %5311 = vst [vmem:[#allocation11_spill] sm:$0xff] %v4499_v15  ;;  %5312 = vst [vmem:[#allocation12_spill] sm:$0xff] %v4501_v57  ;;  %1044 = vperm.xlu1 %3616, %v2981_v12   ;;  %2689 = vperm.xlu0 %3615, %v3175_v54  }
  0xd9   :  { %v4509_v23 = vpop.permute.xlu1 %999  ;;  %v4511_v63 = vpop.permute.xlu0 %2314 }
  0xda   :  { %5313 = vst [vmem:[#allocation13_spill] sm:$0xff] %v4511_v63  ;;  %1704 = vperm.xlu1 %3616, %v3059_v20   ;;  %1374 = vperm.xlu0 %3615, %v3020_v60   ;;  %v3100_v20 = vld [vmem:[%s5259_s1 + $0x2f0] sm:$0xff]  ;;  %v3061_v60 = vld [vmem:[%s5259_s1 + $0x278] sm:$0xff] }
  0xdd   :  { %v4519_v13 = vpop.permute.xlu1 %1659  ;;  %v4521_v14 = vpop.permute.xlu0 %1329 }
  0xde   :  { %5314 = vst [vmem:[#allocation14_spill] sm:$0xff] %v4519_v13  ;;  %5315 = vst [vmem:[#allocation15_spill] sm:$0xff] %v4521_v14  ;;  %2364 = vperm.xlu1 %3616, %v3137_v5   ;;  %2034 = vperm.xlu0 %3615, %v3098_v7  }
  0xe1   :  { %v4529_v29 = vpop.permute.xlu1 %2319  ;;  %v4531_v30 = vpop.permute.xlu0 %1989 }
  0xe2   :  { %5316 = vst [vmem:[#allocation16_spill] sm:$0xff] %v4529_v29  ;;  %5317 = vst [vmem:[#allocation17_spill] sm:$0xff] %v4531_v30  ;;  %1379 = vperm.xlu1 %3616, %v3021_v21   ;;  %2694 = vperm.xlu0 %3615, %v3176_v22   ;;  %v3178_v21 = vld [vmem:[%s5259_s1 + $0x3e0] sm:$0xff]  ;;  %v3139_v22 = vld [vmem:[%s5259_s1 + $0x368] sm:$0xff] }
  0xe3   :  { %v3181_v30 = vld [vmem:[%s5259_s1 + $0x3f8] sm:$0xff] }
  0xe5   :  { %v4539_v41 = vpop.permute.xlu1 %2649  ;;  %v4541_v42 = vpop.permute.xlu0 %2644 }
  0xe6   :  { %5318 = vst [vmem:[#allocation18_spill] sm:$0xff] %v4539_v41  ;;  %5319 = vst [vmem:[#allocation19_spill] sm:$0xff] %v4541_v42  ;;  %2039 = vperm.xlu1 %3616, %v3099_v35   ;;  %1709 = vperm.xlu0 %3615, %v3060_v36  }
  0xe9   :  { %v4549_v12 = vpop.permute.xlu1 %1334  ;;  %v4551_v54 = vpop.permute.xlu0 %1004 }
  0xea   :  { %5320 = vst [vmem:[#allocation20_spill] sm:$0xff] %v4549_v12  ;;  %5321 = vst [vmem:[#allocation21_spill] sm:$0xff] %v4551_v54  ;;  %2699 = vperm.xlu1 %3616, %v3177_v6   ;;  %2369 = vperm.xlu0 %3615, %v3138_v48   ;;  %v3140_v6 = vld [vmem:[%s5259_s1 + $0x370] sm:$0xff]  ;;  %v3101_v48 = vld [vmem:[%s5259_s1 + $0x2f8] sm:$0xff] }
  0xed   :  { %v4559_v5 = vpop.permute.xlu1 %1994  ;;  %v4561_v7 = vpop.permute.xlu0 %1664 }
  0xee   :  { %5322 = vst [vmem:[#allocation22_spill] sm:$0xff] %v4559_v5  ;;  %5323 = vst [vmem:[#allocation23_spill] sm:$0xff] %v4561_v7  ;;  %2044 = vperm.xlu1 %3616, %v3100_v20   ;;  %1714 = vperm.xlu0 %3615, %v3061_v60  }
  0xf1   :  { %v4569_v35 = vpop.permute.xlu1 %2654  ;;  %v4571_v36 = vpop.permute.xlu0 %2324 }
  0xf2   :  { %5324 = vst [vmem:[#allocation24_spill] sm:$0xff] %v4569_v35  ;;  %5325 = vst [vmem:[#allocation25_spill] sm:$0xff] %v4571_v36  ;;  %2704 = vperm.xlu1 %3616, %v3178_v21   ;;  %2374 = vperm.xlu0 %3615, %v3139_v22   ;;  %v3141_v21 = vld [vmem:[%s5259_s1 + $0x378] sm:$0xff]  ;;  %v3179_v22 = vld [vmem:[%s5259_s1 + $0x3e8] sm:$0xff] }
  0xf5   :  { %v4579_v20 = vpop.permute.xlu1 %1009  ;;  %v4581_v60 = vpop.permute.xlu0 %679 }
  0xf6   :  { %5326 = vst [vmem:[#allocation26_spill] sm:$0xff] %v4579_v20  ;;  %2379 = vperm.xlu1 %3616, %v3140_v6   ;;  %2049 = vperm.xlu0 %3615, %v3101_v48   ;;  %v3354_v41 = vpop.f32.mrb[0].mxu0  ;;  %v3386_v63 = vpop.f32.mrb[0].mxu1 }
  0xf7   :  { %v196_v36 = vpop.f32.mrb[1].mxu0  ;;  %v531_v42 = vpop.f32.mrb[1].mxu1  ;;  %v261_v5 = vmax.f32 %v3354_v41, 0.0  ;;  %v596_v13 = vmax.f32 %v3386_v63, 0.0 }
  0xf8   :  { %v259_v15 = vmax.f32 %v196_v36, 0.0  ;;  %v594_v7 = vmax.f32 %v531_v42, 0.0  ;;  %v3355_v6 = vpop.f32.mrb[2].mxu0  ;;  %v3387_v48 = vpop.f32.mrb[2].mxu1  ;;  %v3180_v36 = vld [vmem:[%s5259_s1 + $0x3f0] sm:$0xff] }
  0xf9   :  { %v4589_v35 = vpop.permute.xlu1 %1669  ;;  %v4591_v29 = vpop.permute.xlu0 %1339  ;;  %v262_v39 = vmax.f32 %v3355_v6, 0.0  ;;  %v597_v41 = vmax.f32 %v3387_v48, 0.0  ;;  %v379_v40 = vmul.f32 %v4251_v0, %v261_v5 }
  0xfa   :  { %5327 = vst [vmem:[#allocation27_spill] sm:$0xff] %v4589_v35  ;;  %5328 = vst [vmem:[#allocation28_spill] sm:$0xff] %v4591_v29  ;;  %2384 = vperm.xlu1 %3616, %v3141_v21   ;;  %2709 = vperm.xlu0 %3615, %v3179_v22   ;;  %v199_v45 = vpop.f32.mrb[3].mxu0  ;;  %v534_v27 = vpop.f32.mrb[3].mxu1  ;;  %v377_v42 = vmul.f32 %v4253_v1, %v259_v15  ;;  %v712_v63 = vmul.f32 %v4371_v50, %v594_v7 }
  0xfb   :  { %v260_v35 = vmax.f32 %v199_v45, 0.0  ;;  %v595_v9 = vmax.f32 %v534_v27, 0.0  ;;  %v714_v27 = vmul.f32 %v4381_v53, %v596_v13  ;;  %v380_v50 = vmul.f32 %v4269_v26, %v262_v39 }
  0xfd   :  { %v4600_v28 = vpop.permute.xlu1 %2329  ;;  %v4602_v21 = vpop.permute.xlu0 %1999  ;;  %v378_v22 = vmul.f32 %v4271_v8, %v260_v35  ;;  %v713_v57 = vmul.f32 %v4369_v49, %v595_v9 }
  0xfe   :  { %5329 = vst [vmem:[#allocation29_spill] sm:$0xff] %v4600_v28  ;;  %5330 = vst [vmem:[#allocation30_spill] sm:$0xff] %v4602_v21  ;;  %2719 = vperm.xlu1 %3616, %v3181_v30   ;;  %2714 = vperm.xlu0 %3615, %v3180_v36   ;;  %v3358_v45 = vpop.f32.mrb[4].mxu0  ;;  %v3390_v1 = vpop.f32.mrb[4].mxu1  ;;  %v715_v30 = vmul.f32 %v4379_v52, %v597_v41 }
  0xff   :  { %v393_v6 = vadd.f32 %v378_v22, %v377_v42  ;;  %v728_v20 = vadd.f32 %v713_v57, %v712_v63  ;;  %v265_v28 = vmax.f32 %v3358_v45, 0.0  ;;  %v600_v14 = vmax.f32 %v3390_v1, 0.0  ;;  %v212_v21 = vpop.f32.mrb[5].mxu0  ;;  %v547_v3 = vpop.f32.mrb[5].mxu1 }
 0x100   :  { %v263_v48 = vmax.f32 %v212_v21, 0.0  ;;  %v598_v8 = vmax.f32 %v547_v3, 0.0  ;;  %v3359_v54 = vpop.f32.mrb[6].mxu0  ;;  %v3391_v51 = vpop.f32.mrb[6].mxu1 }
 0x101   :  { %v685_v29 = vpop.permute.xlu1 %684  ;;  %v4610_v49 = vpop.permute.xlu0 %2659  ;;  %v394_v0 = vadd.f32 %v393_v6, %v379_v40  ;;  %v729_v36 = vadd.f32 %v728_v20, %v714_v27  ;;  %v277_v53 = vmax.f32 %v261_v5, %v265_v28  ;;  %v612_v42 = vmax.f32 %v596_v13, %v600_v14 }
 0x102   :  { %5331 = vst [vmem:[#allocation31_spill] sm:$0xff] %v4610_v49  ;;  %v275_v57 = vmax.f32 %v259_v15, %v263_v48  ;;  %v381_v63 = vmul.f32 %v4287_v17, %v263_v48  ;;  %v215_v22 = vpop.f32.mrb[7].mxu0  ;;  %v550_v45 = vpop.f32.mrb[7].mxu1  ;;  %v610_v26 = vmax.f32 %v594_v7, %v598_v8  ;;  %v716_v3 = vmul.f32 %v4391_v56, %v598_v8 }
 0x103   :  { %v395_v1 = vadd.f32 %v394_v0, %v380_v50  ;;  %v730_v21 = vadd.f32 %v729_v36, %v715_v30  ;;  %v266_v34 = vmax.f32 %v3359_v54, 0.0  ;;  %v601_v49 = vmax.f32 %v3391_v51, 0.0 }
 0x104   :  { %v264_v12 = vmax.f32 %v215_v22, 0.0  ;;  %v599_v52 = vmax.f32 %v550_v45, 0.0  ;;  %v383_v15 = vmul.f32 %v4303_v25, %v265_v28  ;;  %v718_v25 = vmul.f32 %v4401_v59, %v600_v14 }
 0x105   :  { %v4615_v40 = vpop.permute.xlu1 %1344  ;;  %v4617_v5 = vpop.permute.xlu0 %1014  ;;  %v396_v20 = vadd.f32 %v395_v1, %v381_v63  ;;  %v731_v13 = vadd.f32 %v730_v21, %v716_v3  ;;  %v278_v17 = vmax.f32 %v262_v39, %v266_v34  ;;  %v613_v27 = vmax.f32 %v597_v41, %v601_v49 }
 0x106   :  { %v3362_v6 = vpop.f32.mrb[8].mxu0  ;;  %v3394_v50 = vpop.f32.mrb[8].mxu1  ;;  %v276_v7 = vmax.f32 %v260_v35, %v264_v12  ;;  %v382_v56 = vmul.f32 %v4285_v16, %v264_v12  ;;  %v611_v48 = vmax.f32 %v595_v9, %v599_v52  ;;  %v717_v51 = vmul.f32 %v4389_v55, %v599_v52 }
 0x107   :  { %v228_v54 = vpop.f32.mrb[9].mxu0  ;;  %v563_v8 = vpop.f32.mrb[9].mxu1  ;;  %v269_v30 = vmax.f32 %v3362_v6, 0.0  ;;  %v604_v0 = vmax.f32 %v3394_v50, 0.0  ;;  %v384_v28 = vmul.f32 %v4301_v24, %v266_v34  ;;  %v719_v55 = vmul.f32 %v4399_v58, %v601_v49 }
 0x108   :  { %v267_v36 = vmax.f32 %v228_v54, 0.0  ;;  %v602_v22 = vmax.f32 %v563_v8, 0.0  ;;  %v397_v39 = vadd.f32 %v396_v20, %v382_v56  ;;  %v732_v35 = vadd.f32 %v731_v13, %v717_v51  ;;  %v3363_v16 = vpop.f32.mrb[10].mxu0  ;;  %v3395_v9 = vpop.f32.mrb[10].mxu1 }
 0x109   :  { %v4622_v63 = vpop.permute.xlu1 %2004  ;;  %v4624_v45 = vpop.permute.xlu0 %1674  ;;  %v281_v12 = vmax.f32 %v277_v53, %v269_v30  ;;  %v616_v41 = vmax.f32 %v612_v42, %v604_v0  ;;  %v722_v1 = vmul.f32 %v685_v29, %v604_v0  ;;  %v270_v24 = vmax.f32 %v3363_v16, 0.0 }
 0x10a   :  { %v231_v3 = vpop.f32.mrb[11].mxu0  ;;  %v566_v21 = vpop.f32.mrb[11].mxu1  ;;  %v398_v52 = vadd.f32 %v397_v39, %v383_v15  ;;  %v733_v6 = vadd.f32 %v732_v35, %v718_v25  ;;  %v279_v50 = vmax.f32 %v275_v57, %v267_v36  ;;  %v385_v54 = vmul.f32 %v4319_v32, %v267_v36 }
 0x10b   :  { %v614_v8 = vmax.f32 %v610_v26, %v602_v22  ;;  %v720_v59 = vmul.f32 %v4411_v62, %v602_v22  ;;  %v605_v34 = vmax.f32 %v3395_v9, 0.0  ;;  %v268_v53 = vmax.f32 %v231_v3, 0.0 }
 0x10c   :  { %v399_v58 = vadd.f32 %v398_v52, %v384_v28  ;;  %v734_v49 = vadd.f32 %v733_v6, %v719_v55  ;;  %v603_v29 = vmax.f32 %v566_v21, 0.0  ;;  %v387_v42 = vmul.f32 %v4335_v38, %v269_v30 }
 0x10d   :  { %v4631_v14 = vpop.permute.xlu1 %2664  ;;  %v4633_v20 = vpop.permute.xlu0 %2334  ;;  %v282_v13 = vmax.f32 %v278_v17, %v270_v24  ;;  %v617_v15 = vmax.f32 %v613_v27, %v605_v34  ;;  %v280_v62 = vmax.f32 %v276_v7, %v268_v53  ;;  %v386_v51 = vmul.f32 %v4317_v31, %v268_v53 }
 0x10e   :  { %5332 = vst [vmem:[#allocation32_spill] sm:$0xff] %v4631_v14  ;;  %5333 = vst [vmem:[#allocation33_spill] sm:$0xff] %v4633_v20  ;;  %v3366_v57 = vpop.f32.mrb[12].mxu0  ;;  %v4636_v56 = vpop.f32.mrb[12].mxu1  ;;  %v400_v32 = vadd.f32 %v399_v58, %v385_v54  ;;  %v735_v26 = vadd.f32 %v734_v49, %v720_v59  ;;  %v615_v22 = vmax.f32 %v611_v48, %v603_v29 }
 0x10f   :  { %v244_v0 = vpop.f32.mrb[13].mxu0  ;;  %v4639_v36 = vpop.f32.mrb[13].mxu1  ;;  %v721_v25 = vmul.f32 %v4581_v60, %v603_v29  ;;  %v273_v28 = vmax.f32 %v3366_v57, 0.0  ;;  %v5265_v39 = vmax.f32 %v4636_v56, 0.0  ;;  %v388_v31 = vmul.f32 %v4333_v37, %v270_v24 }
 0x110   :  { %v401_v27 = vadd.f32 %v400_v32, %v386_v51  ;;  %v271_v30 = vmax.f32 %v244_v0, 0.0  ;;  %v606_v35 = vmax.f32 %v4639_v36, 0.0  ;;  %v3367_v7 = vpop.f32.mrb[14].mxu0  ;;  %v4646_v9 = vpop.f32.mrb[14].mxu1 }
 0x111   :  { %v4643_v38 = vpop.permute.xlu1 %1019  ;;  %v690_v17 = vpop.permute.xlu0 %689  ;;  %v736_v55 = vadd.f32 %v735_v26, %v721_v25  ;;  %v285_v48 = vmax.f32 %v281_v12, %v273_v28  ;;  %v620_v60 = vmax.f32 %v616_v41, %v5265_v39  ;;  %v274_v58 = vmax.f32 %v3367_v7, 0.0 }
 0x112   :  { %v723_v16 = vmul.f32 %v690_v17, %v605_v34  ;;  %v247_v3 = vpop.f32.mrb[15].mxu0  ;;  %v4651_v21 = vpop.f32.mrb[15].mxu1  ;;  %v402_v52 = vadd.f32 %v401_v27, %v387_v42  ;;  %v283_v6 = vmax.f32 %v279_v50, %v271_v30  ;;  %v389_v54 = vmul.f32 %v4351_v44, %v271_v30 }
 0x113   :  { %v618_v59 = vmax.f32 %v614_v8, %v606_v35  ;;  %v737_v34 = vadd.f32 %v736_v55, %v722_v1  ;;  %v5264_v49 = vmax.f32 %v4646_v9, 0.0  ;;  %v272_v37 = vmax.f32 %v247_v3, 0.0 }
 0x114   :  { %v391_v41 = vmul.f32 %v4361_v47, %v273_v28  ;;  %v403_v53 = vadd.f32 %v402_v52, %v388_v31  ;;  %v5266_v29 = vmax.f32 %v4651_v21, 0.0  ;;  %v286_v42 = vmax.f32 %v282_v13, %v274_v58 }
 0x115   :  { %v4657_v24 = vpop.permute.xlu1 %1679  ;;  %v4659_v12 = vpop.permute.xlu0 %1349  ;;  %v738_v50 = vadd.f32 %v737_v34, %v723_v16  ;;  %v392_v44 = vmul.f32 %v4359_v46, %v274_v58  ;;  %v621_v1 = vmax.f32 %v617_v15, %v5264_v49  ;;  %v284_v26 = vmax.f32 %v280_v62, %v272_v37 }
 0x116   :  { %v4666_v8 = vpop.f32.mrb[16].mxu0  ;;  %v4668_v57 = vpop.f32.mrb[16].mxu1  ;;  %v404_v32 = vadd.f32 %v403_v53, %v389_v54  ;;  %v390_v51 = vmul.f32 %v4349_v43, %v272_v37  ;;  %v619_v47 = vmax.f32 %v615_v22, %v5266_v29  ;;  %v288_v13 = vmax.f32 %v285_v48, %v286_v42 }
 0x117   :  { %v4673_v0 = vpop.f32.mrb[17].mxu0  ;;  %v4675_v25 = vpop.f32.mrb[17].mxu1  ;;  %v623_v46 = vmax.f32 %v620_v60, %v621_v1  ;;  %v931_v28 = vmax.f32 %v4666_v8, 0.0  ;;  %v1266_v15 = vmax.f32 %v4668_v57, 0.0  ;;  %v287_v62 = vmax.f32 %v283_v6, %v284_v26 }
 0x118   :  { %v405_v30 = vadd.f32 %v404_v32, %v390_v51  ;;  %v622_v43 = vmax.f32 %v618_v59, %v619_v47  ;;  %v929_v16 = vmax.f32 %v4673_v0, 0.0  ;;  %v4684_v22 = vpop.f32.mrb[18].mxu0  ;;  %v4686_v7 = vpop.f32.mrb[18].mxu1  ;;  %v1264_v48 = vmax.f32 %v4675_v25, 0.0  ;;  %v3692_v25 = vld [vmem:[%s5262_s3 + $0x18] sm:$0xff]  }
 0x119   :  { %v4679_v17 = vpop.permute.xlu1 %2339  ;;  %v4681_v27 = vpop.permute.xlu0 %2009  ;;  %v1049_v31 = vmul.f32 %v4419_v2, %v931_v28  ;;  %v1384_v55 = vmul.f32 %v4439_v18, %v1266_v15  ;;  %v932_v60 = vmax.f32 %v4684_v22, 0.0  ;;  %v289_v6 = vmax.f32 %v287_v62, %v288_v13  ;;  %v3689_v2 = vld [vmem:[%s5262_s3] sm:$0xff]  }
 0x11a   :  { %v4692_v3 = vpop.f32.mrb[19].mxu0  ;;  %v4694_v52 = vpop.f32.mrb[19].mxu1  ;;  %v406_v54 = vadd.f32 %v405_v30, %v391_v41  ;;  %v624_v59 = vmax.f32 %v622_v43, %v623_v46  ;;  %v1047_v34 = vmul.f32 %v4409_v61, %v929_v16  ;;  %v1382_v18 = vmul.f32 %v4431_v11, %v1264_v48 }
 0x11b   :  { %v1050_v58 = vmul.f32 %v4441_v19, %v932_v60  ;;  %v5271_v37 = vmax.f32 %v4686_v7, 0.0  ;;  %v5268_v41 = vmax.f32 %v4692_v3, 0.0  ;;  %v290_v61 = vrot.slane %v289_v6, 4 }
 0x11c   :  { %v407_v1 = vadd.f32 %v406_v54, %v392_v44  ;;  %v625_v8 = vrot.slane %v624_v59, 4  ;;  %v5267_v57 = vmax.f32 %v4694_v52, 0.0  ;;  %v5269_v43 = vmov 0.0  }
 0x11d   :  { %v695_v53 = vpop.permute.xlu1 %694  ;;  %v4710_v42 = vpop.permute.xlu0 %2669  ;;  %v1385_v11 = vmul.f32 %v4459_v33, %v5271_v37  ;;  %v1048_v19 = vmul.f32 %v4421_v4, %v5268_v41  ;;  %v291_v47 = vmax.f32 %v289_v6, %v290_v61  ;;  %3592 = vmatprep.subr.bf16.mxu0 %v5269_v43  ;;  %v3690_v4 = vld [vmem:[%s5262_s3 + $0x8] sm:$0xff]   ;;  %v5346_v22 = vmax.f32 %v4694_v52, 0.0  ;;  %v3693_v52 = vld [vmem:[%s5262_s3 + $0x20] sm:$0xff]  }
 0x11e   :  { %5334 = vst [vmem:[#allocation34_spill] sm:$0xff] %v4710_v42  ;;  %v724_v32 = vmul.f32 %v695_v53, %v606_v35  ;;  %v3422_v26 = vpop.f32.mrb[20].mxu0  ;;  %v3454_v51 = vpop.f32.mrb[20].mxu1  ;;  %v408_v13 = vrot.slane %v407_v1, 4  ;;  %v626_v46 = vmax.f32 %v624_v59, %v625_v8  ;;  %v1383_v44 = vmul.f32 %v4429_v10, %v5267_v57  ;;  %3593 = vmatpush3.bf16.msra.mxu0 %v3689_v2 }
 0x11f   :  { %v882_v62 = vpop.f32.mrb[21].mxu0  ;;  %v1217_v30 = vpop.f32.mrb[21].mxu1  ;;  %v1063_v33 = vadd.f32 %v1048_v19, %v1047_v34  ;;  %v935_v35 = vmax.f32 %v3422_v26, 0.0  ;;  %v1270_v6 = vmax.f32 %v3454_v51, 0.0  ;;  %v292_v10 = vrot.slane %v291_v47, 2  ;;  %3594 = vmatprep.subr.bf16.mxu0 %v5269_v43 }
 0x120   :  { %v4728_v36 = vadd.f32 %v738_v50, %v724_v32  ;;  %v409_v53 = vadd.f32 %v408_v13, %v407_v1  ;;  %v627_v61 = vrot.slane %v626_v46, 2  ;;  %v1398_v8 = vadd.f32 %v1383_v44, %v1382_v18  ;;  %v3423_v49 = vpop.f32.mrb[22].mxu0  ;;  %v3455_v39 = vpop.f32.mrb[22].mxu1  ;;  %v3691_v18 = vld [vmem:[%s5262_s3 + $0x10] sm:$0xff]  }
 0x121   :  { %v4730_v54 = vpop.permute.xlu1 %1354  ;;  %v4732_v59 = vpop.permute.xlu0 %1024  ;;  %v1064_v29 = vadd.f32 %v1063_v33, %v1049_v31  ;;  %v4735_v57 = vmax.f32 %v931_v28, %v935_v35  ;;  %v4738_v50 = vmul.f32 %v4509_v23, %v935_v35  ;;  %v4740_v34 = vmax.f32 %v1266_v15, %v1270_v6  ;;  %v5335_v13 = vld [vmem:[#allocation20_spill] sm:$0xff] }
 0x122   :  { %v885_v19 = vpop.f32.mrb[23].mxu0  ;;  %v1220_v32 = vpop.f32.mrb[23].mxu1  ;;  %v293_v26 = vmax.f32 %v291_v47, %v292_v10  ;;  %v410_v2 = vrot.slane %v409_v53, 2  ;;  %v628_v51 = vmax.f32 %v626_v46, %v627_v61  ;;  %v1399_v1 = vadd.f32 %v1398_v8, %v1384_v55  ;;  %3595 = vmatpush3.bf16.msra.mxu0 %v3690_v4 }
 0x123   :  { %v4746_v44 = vmul.f32 %v5335_v13, %v1270_v6  ;;  %v933_v28 = vmax.f32 %v882_v62, 0.0  ;;  %v1065_v31 = vadd.f32 %v1064_v29, %v1050_v58  ;;  %v1268_v33 = vmax.f32 %v1217_v30, 0.0  ;;  %3596 = vmatprep.subr.bf16.mxu0 %v5269_v43  ;;  %v5336_v6 = vld [vmem:[#allocation4_spill] sm:$0xff]  ;;  %v5337_v58 = vld [vmem:[#allocation10_spill] sm:$0xff] }
 0x124   :  { %v294_v35 = vrot.slane %v293_v26, 1  ;;  %v4752_v47 = vadd.f32 %v410_v2, %v409_v53  ;;  %v629_v46 = vrot.slane %v628_v51, 1  ;;  %v1400_v55 = vadd.f32 %v1399_v1, %v1385_v11 }
 0x125   :  { %v4748_v23 = vpop.permute.xlu1 %2014  ;;  %v4750_v15 = vpop.permute.xlu0 %1684  ;;  %v945_v10 = vmax.f32 %v929_v16, %v933_v28  ;;  %v1051_v61 = vmul.f32 %v5336_v6, %v933_v28  ;;  %v1280_v29 = vmax.f32 %v1264_v48, %v1268_v33  ;;  %v1386_v62 = vmul.f32 %v5337_v58, %v1268_v33  ;;  %v5345_v6 = vld [vmem:[#allocation7_spill] sm:$0xff] }
 0x126   :  { %v3426_v30 = vpop.f32.mrb[24].mxu0  ;;  %v3458_v8 = vpop.f32.mrb[24].mxu1  ;;  %v295_v4 = vmax.f32 %v293_v26, %v294_v35  ;;  %v630_v13 = vmax.f32 %v628_v51, %v629_v46  ;;  %v936_v53 = vmax.f32 %v3423_v49, 0.0  ;;  %v1271_v2 = vmax.f32 %v3455_v39, 0.0  ;;  %3597 = vmatpush3.bf16.msra.mxu0 %v3691_v18  ;;  %v5340_v39 = vld [vmem:[#allocation21_spill] sm:$0xff]  ;;  %v5343_v35 = vld [vmem:[#allocation28_spill] sm:$0xff] }
 0x127   :  { %v898_v41 = vpop.f32.mrb[25].mxu0  ;;  %v1233_v11 = vpop.f32.mrb[25].mxu1  ;;  %v1066_v1 = vadd.f32 %v1065_v31, %v1051_v61  ;;  %v1401_v43 = vadd.f32 %v1400_v55, %v1386_v62  ;;  %v934_v37 = vmax.f32 %v885_v19, 0.0  ;;  %v1269_v0 = vmax.f32 %v1220_v32, 0.0 }
 0x128   :  { %v296_v48 = vmax.f32 %v295_v4, 0.0  ;;  %v948_v49 = vmax.f32 %v932_v60, %v936_v53  ;;  %v1054_v26 = vmul.f32 %v5340_v39, %v936_v53  ;;  %v5341_v51 = vmax.f32 %v4686_v7, 0.0  ;;  %v3427_v19 = vpop.f32.mrb[26].mxu0  ;;  %v4773_v32 = vpop.f32.mrb[26].mxu1  ;;  %v5347_v7 = vld [vmem:[#allocation15_spill] sm:$0xff] }
 0x129   :  { %v4761_v16 = vpop.permute.xlu1 %2674  ;;  %v4763_v28 = vpop.permute.xlu0 %2344  ;;  %v5342_v33 = vmov 0.0   ;;  %v1389_v18 = vmul.f32 %v5343_v35, %v1271_v2  ;;  %v5344_v46 = vmax.f32 %v4692_v3, 0.0  ;;  %v1052_v61 = vmul.f32 %v5345_v6, %v934_v37 }
 0x12a   :  { %5338 = vst [vmem:[#allocation20_spill] sm:$0xff] %v4761_v16  ;;  %5339 = vst [vmem:[#allocation4_spill] sm:$0xff] %v4763_v28  ;;  %v1283_v31 = vmax.f32 %v5341_v51, %v1271_v2  ;;  %3598 = vmatprep.subr.bf16.mxu0 %v5342_v33  ;;  %v1281_v60 = vmax.f32 %v5346_v22, %v1269_v0  ;;  %v901_v58 = vpop.f32.mrb[27].mxu0  ;;  %v1236_v62 = vpop.f32.mrb[27].mxu1  ;;  %v4782_v4 = vmax.f32 %v296_v48, %v630_v13 }
 0x12b   :  { %v946_v55 = vmax.f32 %v5344_v46, %v934_v37  ;;  %v1387_v53 = vmul.f32 %v5347_v7, %v1269_v0  ;;  %v939_v39 = vmax.f32 %v3426_v30, 0.0  ;;  %v1274_v51 = vmax.f32 %v3458_v8, 0.0  ;;  %3599 = vmatpush3.bf16.msra.mxu0 %v3692_v25 }
 0x12c   :  { %v1067_v42 = vadd.f32 %v1066_v1, %v1052_v61  ;;  %v937_v20 = vmax.f32 %v898_v41, 0.0  ;;  %v1272_v28 = vmax.f32 %v1233_v11, 0.0  ;;  %v940_v2 = vmax.f32 %v3427_v19, 0.0  ;;  %3600 = vmatprep.subr.bf16.mxu0 %v5342_v33  ;;  %v5348_v11 = vld [vmem:[#allocation26_spill] sm:$0xff] }
 0x12d   :  { %v1030_v35 = vpop.permute.xlu1 %1029  ;;  %v700_v3 = vpop.permute.xlu0 %699  ;;  %v1402_v37 = vadd.f32 %v1401_v43, %v1387_v53  ;;  %v951_v46 = vmax.f32 %v4735_v57, %v939_v39  ;;  %v1057_v13 = vmul.f32 %v4643_v38, %v939_v39  ;;  %v1286_v0 = vmax.f32 %v4740_v34, %v1274_v51 }
 0x12e   :  { %v1068_v41 = vadd.f32 %v1067_v42, %v4738_v50  ;;  %v1392_v30 = vmul.f32 %v4730_v54, %v1274_v51  ;;  %v949_v8 = vmax.f32 %v945_v10, %v937_v20  ;;  %v1055_v1 = vmul.f32 %v5348_v11, %v937_v20  ;;  %v4795_v25 = vpop.f32.mrb[28].mxu0  ;;  %v4797_v48 = vpop.f32.mrb[28].mxu1 }
 0x12f   :  { %v1403_v43 = vadd.f32 %v1402_v37, %v4746_v44  ;;  %v1284_v57 = vmax.f32 %v1280_v29, %v1272_v28  ;;  %v1390_v38 = vmul.f32 %v4615_v40, %v1272_v28  ;;  %v952_v19 = vmax.f32 %v948_v49, %v940_v2  ;;  %v914_v34 = vpop.f32.mrb[29].mxu0  ;;  %v4801_v6 = vpop.f32.mrb[29].mxu1  ;;  %3601 = vmatpush3.bf16.msra.mxu0 %v3693_v52  ;;  %v3694_v44 = vld [vmem:[%s5262_s3 + $0x28] sm:$0xff]  }
 0x130   :  { %v1069_v61 = vadd.f32 %v1068_v41, %v1054_v26  ;;  %v4804_v42 = vmul.f32 %v4732_v59, %v940_v2  ;;  %v1275_v54 = vmax.f32 %v4773_v32, 0.0  ;;  %v938_v20 = vmax.f32 %v901_v58, 0.0  ;;  %v4815_v59 = vpop.f32.mrb[30].mxu0  ;;  %v4817_v22 = vpop.f32.mrb[30].mxu1  ;;  %3602 = vmatprep.subr.bf16.mxu0 %v5342_v33 }
 0x131   :  { %v4807_v50 = vpop.permute.xlu1 %1689  ;;  %v1360_v10 = vpop.permute.xlu0 %1359  ;;  %v1404_v40 = vadd.f32 %v1403_v43, %v1389_v18  ;;  %v1273_v29 = vmax.f32 %v1236_v62, 0.0  ;;  %v5349_v28 = vmax.f32 %v4651_v21, 0.0  ;;  %v5276_v26 = vmax.f32 %v4795_v25, 0.0  ;;  %5350 = vst [vmem:[#allocation10_spill] sm:$0xff] %v4817_v22 }
 0x132   :  { %v1070_v32 = vadd.f32 %v1069_v61, %v1055_v1  ;;  %v1287_v58 = vmax.f32 %v1283_v31, %v1275_v54  ;;  %v950_v7 = vmax.f32 %v946_v55, %v938_v20  ;;  %v1056_v53 = vmul.f32 %v4617_v5, %v938_v20  ;;  %v4821_v39 = vpop.f32.mrb[31].mxu0  ;;  %v4823_v18 = vpop.f32.mrb[31].mxu1 }
 0x133   :  { %v725_v49 = vmul.f32 %v700_v3, %v5349_v28  ;;  %v1405_v62 = vadd.f32 %v1404_v40, %v1390_v38  ;;  %v1285_v21 = vmax.f32 %v1281_v60, %v1273_v29  ;;  %v1391_v51 = vmul.f32 %v4659_v12, %v1273_v29  ;;  %3603 = vmatpush3.bf16.msra.mxu0 %v3694_v44  ;;  %v3695_v60 = vld [vmem:[%s5262_s3 + $0x30] sm:$0xff]  }
 0x134   :  { %v1071_v3 = vadd.f32 %v1070_v32, %v1056_v53  ;;  %v955_v52 = vmax.f32 %v951_v46, %v5276_v26  ;;  %v5273_v37 = vmax.f32 %v4797_v48, 0.0  ;;  %v941_v31 = vmax.f32 %v914_v34, 0.0  ;;  %3604 = vmatprep.subr.bf16.mxu0 %v5342_v33 }
 0x135   :  { %v740_v2 = vadd.f32 %v4728_v36, %v725_v49  ;;  %v4830_v55 = vpop.permute.xlu1 %2349  ;;  %v4832_v5 = vpop.permute.xlu0 %2019  ;;  %v1406_v41 = vadd.f32 %v1405_v62, %v1391_v51  ;;  %v1276_v12 = vmax.f32 %v4801_v6, 0.0  ;;  %v1393_v36 = vmul.f32 %v1360_v10, %v1275_v54 }
 0x136   :  { %5351 = vst [vmem:[#allocation21_spill] sm:$0xff] %v4830_v55  ;;  %v5274_v11 = vmax.f32 %v4815_v59, 0.0  ;;  %v1072_v46 = vadd.f32 %v1071_v3, %v1057_v13  ;;  %v1290_v1 = vmax.f32 %v1286_v0, %v5273_v37  ;;  %v953_v43 = vmax.f32 %v949_v8, %v941_v31  ;;  %v4844_v34 = vpop.f32.mrb[32].mxu0  ;;  %v4846_v61 = vpop.f32.mrb[32].mxu1  ;;  %v5353_v3 = vld [vmem:[#allocation6_spill] sm:$0xff] }
 0x137   :  { %v4842_v38 = vmul.f32 %v1030_v35, %v941_v31  ;;  %v1288_v20 = vmax.f32 %v1284_v57, %v1276_v12  ;;  %v1407_v44 = vadd.f32 %v1406_v41, %v1392_v30  ;;  %v5272_v54 = vmax.f32 %v4817_v22, 0.0  ;;  %v4851_v10 = vpop.f32.mrb[33].mxu0  ;;  %v4853_v13 = vpop.f32.mrb[33].mxu1  ;;  %3605 = vmatpush3.bf16.msra.mxu0 %v3695_v60  ;;  %v3696_v30 = vld [vmem:[%s5262_s3 + $0x38] sm:$0xff]  }
 0x138   :  { %v956_v6 = vmax.f32 %v952_v19, %v5274_v11  ;;  %v942_v0 = vmax.f32 %v4821_v39, 0.0  ;;  %v5275_v35 = vmax.f32 %v4823_v18, 0.0  ;;  %v1601_v8 = vmax.f32 %v4844_v34, 0.0  ;;  %v4867_v53 = vpop.f32.mrb[34].mxu0  ;;  %v4869_v39 = vpop.f32.mrb[34].mxu1  ;;  %3606 = vmatprep.subr.bf16.mxu0 %v5342_v33  ;;  %v5355_v34 = vld [vmem:[#allocation3_spill] sm:$0xff] }
 0x139   :  { %v5279_v40 = vmax.f32 %v4846_v61, 0.0  ;;  %v705_v29 = vpop.permute.xlu1 %704  ;;  %v4859_v57 = vpop.permute.xlu0 %2679  ;;  %v1408_v19 = vadd.f32 %v1407_v44, %v1393_v36  ;;  %v1291_v49 = vmax.f32 %v1287_v58, %v5272_v54  ;;  %v5277_v32 = vmax.f32 %v4851_v10, 0.0 }
 0x13a   :  { %5352 = vst [vmem:[#allocation28_spill] sm:$0xff] %v4859_v57  ;;  %v958_v28 = vmax.f32 %v955_v52, %v956_v6  ;;  %v954_v62 = vmax.f32 %v950_v7, %v942_v0  ;;  %v1289_v51 = vmax.f32 %v1285_v21, %v5275_v35  ;;  %v1719_v31 = vmul.f32 %v5353_v3, %v1601_v8  ;;  %v5354_v52 = vld [vmem:[#allocation12_spill] sm:$0xff]  ;;  %v4878_v41 = vpop.f32.mrb[35].mxu0  ;;  %v4880_v58 = vpop.f32.mrb[35].mxu1 }
 0x13b   :  { %v2054_v60 = vmul.f32 %v5354_v52, %v5279_v40  ;;  %v1293_v36 = vmax.f32 %v1290_v1, %v1291_v49  ;;  %v1717_v44 = vmul.f32 %v5355_v34, %v5277_v32  ;;  %v5278_v7 = vmax.f32 %v4853_v13, 0.0  ;;  %3607 = vmatpush3.bf16.msra.mxu0 %v3696_v30  ;;  %v5357_v1 = vld [vmem:[#allocation5_spill] sm:$0xff] }
 0x13c   :  { %v5356_v6 = vmax.f32 %v4636_v56, 0.0  ;;  %v957_v54 = vmax.f32 %v953_v43, %v954_v62  ;;  %v1292_v3 = vmax.f32 %v1288_v20, %v1289_v51  ;;  %v5280_v37 = vmax.f32 %v4867_v53, 0.0  ;;  %v5358_v20 = vld [vmem:[#allocation9_spill] sm:$0xff] }
 0x13d   :  { %v5282_v52 = vmax.f32 %v4869_v39, 0.0  ;;  %v1365_v11 = vpop.permute.xlu1 %1364  ;;  %v1035_v35 = vpop.permute.xlu0 %1034  ;;  %v2052_v49 = vmul.f32 %v5357_v1, %v5278_v7  ;;  %v5283_v34 = vmax.f32 %v4878_v41, 0.0  ;;  %v5284_v56 = vmax.f32 %v4880_v58, 0.0  ;;  %v5359_v51 = vld [vmem:[#allocation17_spill] sm:$0xff]  ;;  %v5361_v1 = vld [vmem:[#allocation8_spill] sm:$0xff] }
 0x13e   :  { %v726_v21 = vmul.f32 %v705_v29, %v5356_v6  ;;  %v959_v29 = vmax.f32 %v957_v54, %v958_v28  ;;  %v1294_v43 = vmax.f32 %v1292_v3, %v1293_v36  ;;  %v1720_v62 = vmul.f32 %v5358_v20, %v5280_v37  ;;  %v3486_v6 = vpop.f32.mrb[36].mxu0  ;;  %v3518_v32 = vpop.f32.mrb[36].mxu1 }
 0x13f   :  { %v2055_v30 = vmul.f32 %v5359_v51, %v5282_v52  ;;  %v2053_v7 = vmul.f32 %v5361_v1, %v5284_v56  ;;  %v1394_v54 = vmul.f32 %v1365_v11, %v1276_v12  ;;  %v1060_v28 = vmul.f32 %v1035_v35, %v942_v0  ;;  %v1552_v36 = vpop.f32.mrb[37].mxu0  ;;  %v1887_v3 = vpop.f32.mrb[37].mxu1 }
 0x140   :  { %v4893_v26 = vadd.f32 %v740_v2, %v726_v21  ;;  %v5360_v2 = vld [vmem:[#allocation2_spill] sm:$0xff]  ;;  %v960_v40 = vrot.slane %v959_v29, 4  ;;  %v1295_v20 = vrot.slane %v1294_v43, 4  ;;  %v1073_v37 = vadd.f32 %v1072_v46, %v4804_v42  ;;  %v3487_v14 = vpop.f32.mrb[38].mxu0  ;;  %v3519_v1 = vpop.f32.mrb[38].mxu1 }
 0x141   :  { %v1718_v21 = vmul.f32 %v5360_v2, %v5283_v34  ;;  %v1605_v33 = vmax.f32 %v3486_v6, 0.0  ;;  %v4910_v51 = vpop.permute.xlu1 %2024  ;;  %v4912_v52 = vpop.permute.xlu0 %1694  ;;  %v2068_v57 = vadd.f32 %v2053_v7, %v2052_v49  ;;  %v4914_v2 = vadd.f32 %v1408_v19, %v1394_v54  ;;  %v5362_v6 = vld [vmem:[#allocation27_spill] sm:$0xff] }
 0x142   :  { %v1940_v34 = vmax.f32 %v3518_v32, 0.0  ;;  %v961_v12 = vmax.f32 %v959_v29, %v960_v40  ;;  %v1296_v11 = vmax.f32 %v1294_v43, %v1295_v20  ;;  %v1074_v0 = vadd.f32 %v1073_v37, %v4842_v38  ;;  %v1555_v56 = vpop.f32.mrb[39].mxu0  ;;  %v1890_v22 = vpop.f32.mrb[39].mxu1  ;;  %v5366_v20 = vld [vmem:[#allocation14_spill] sm:$0xff] }
 0x143   :  { %v1733_v55 = vadd.f32 %v1718_v21, %v1717_v44  ;;  %v1617_v35 = vmax.f32 %v1601_v8, %v1605_v33  ;;  %v2069_v46 = vadd.f32 %v2068_v57, %v2054_v60  ;;  %v4918_v16 = vmul.f32 %v5362_v6, %v1605_v33  ;;  %v5368_v6 = vld [vmem:[#allocation22_spill] sm:$0xff] }
 0x144   :  { %v5363_v44 = vmax.f32 %v4846_v61, 0.0  ;;  %v962_v19 = vrot.slane %v961_v12, 2  ;;  %v1297_v49 = vrot.slane %v1296_v11, 2  ;;  %v4922_v32 = vadd.f32 %v1074_v0, %v1060_v28 }
 0x145   :  { %v1734_v42 = vadd.f32 %v1733_v55, %v1719_v31  ;;  %v4925_v40 = vmul.f32 %v4622_v63, %v1940_v34  ;;  %v4927_v29 = vpop.permute.xlu1 %2684  ;;  %v4929_v37 = vpop.permute.xlu0 %2354  ;;  %v1603_v38 = vmax.f32 %v1552_v36, 0.0  ;;  %v1938_v8 = vmax.f32 %v1887_v3, 0.0 }
 0x146   :  { %v1952_v7 = vmax.f32 %v5363_v44, %v1940_v34  ;;  %5364 = vst [vmem:[#allocation7_spill] sm:$0xff] %v4929_v37  ;;  %v2070_v57 = vadd.f32 %v2069_v46, %v2055_v30  ;;  %v963_v33 = vmax.f32 %v961_v12, %v962_v19  ;;  %v1298_v31 = vmax.f32 %v1296_v11, %v1297_v49  ;;  %v3490_v43 = vpop.f32.mrb[40].mxu0  ;;  %v3522_v21 = vpop.f32.mrb[40].mxu1 }
 0x147   :  { %v1735_v55 = vadd.f32 %v1734_v42, %v1720_v62  ;;  %v1606_v60 = vmax.f32 %v3487_v14, 0.0  ;;  %v1941_v61 = vmax.f32 %v3519_v1, 0.0  ;;  %v5365_v54 = vmax.f32 %v4851_v10, 0.0  ;;  %v1568_v36 = vpop.f32.mrb[41].mxu0  ;;  %v1903_v62 = vpop.f32.mrb[41].mxu1 }
 0x148   :  { %v1721_v63 = vmul.f32 %v5366_v20, %v1603_v38  ;;  %v5367_v34 = vmax.f32 %v4853_v13, 0.0  ;;  %v2056_v44 = vmul.f32 %v5368_v6, %v1938_v8  ;;  %v964_v3 = vrot.slane %v963_v33, 1 }
 0x149   :  { %v1615_v28 = vmax.f32 %v5365_v54, %v1603_v38  ;;  %v1299_v30 = vrot.slane %v1298_v31, 1  ;;  %v5369_v12 = vmax.f32 %v4867_v53, 0.0  ;;  %v1724_v1 = vmul.f32 %v4624_v45, %v1606_v60  ;;  %v1040_v11 = vpop.permute.xlu1 %1039  ;;  %v710_v42 = vpop.permute.xlu0 %709 }
 0x14a   :  { %v1950_v0 = vmax.f32 %v5367_v34, %v1938_v8  ;;  %v1736_v10 = vadd.f32 %v1735_v55, %v1721_v63  ;;  %v2071_v46 = vadd.f32 %v2070_v57, %v2056_v44  ;;  %v5370_v19 = vmax.f32 %v4869_v39, 0.0  ;;  %v3491_v38 = vpop.f32.mrb[42].mxu0  ;;  %v4943_v8 = vpop.f32.mrb[42].mxu1 }
 0x14b   :  { %v1618_v14 = vmax.f32 %v5369_v12, %v1606_v60  ;;  %v2059_v13 = vmul.f32 %v4681_v27, %v1941_v61  ;;  %v965_v54 = vmax.f32 %v963_v33, %v964_v3  ;;  %v1300_v20 = vmax.f32 %v1298_v31, %v1299_v30  ;;  %v1571_v53 = vpop.f32.mrb[43].mxu0  ;;  %v4945_v12 = vpop.f32.mrb[43].mxu1  ;;  %v5372_v27 = vld [vmem:[#allocation23_spill] sm:$0xff] }
 0x14c   :  { %v1953_v49 = vmax.f32 %v5370_v19, %v1941_v61  ;;  %v1604_v34 = vmax.f32 %v1555_v56, 0.0  ;;  %v1939_v6 = vmax.f32 %v1890_v22, 0.0  ;;  %v1609_v45 = vmax.f32 %v3490_v43, 0.0  ;;  %v5374_v56 = vld [vmem:[#allocation30_spill] sm:$0xff] }
 0x14d   :  { %v1944_v60 = vmax.f32 %v3522_v21, 0.0  ;;  %v1607_v37 = vmax.f32 %v1568_v36, 0.0  ;;  %v1942_v55 = vmax.f32 %v1903_v62, 0.0  ;;  %v966_v57 = vmax.f32 %v4782_v4, %v965_v54  ;;  %v4953_v31 = vpop.permute.xlu1 %1699  ;;  %v1370_v22 = vpop.permute.xlu0 %1369 }
 0x14e   :  { %v5371_v39 = vmax.f32 %v4878_v41, 0.0  ;;  %v1722_v61 = vmul.f32 %v5372_v27, %v1604_v34  ;;  %v5373_v44 = vmax.f32 %v4880_v58, 0.0  ;;  %v2057_v3 = vmul.f32 %v5374_v56, %v1939_v6  ;;  %v4962_v19 = vpop.f32.mrb[44].mxu0  ;;  %v4964_v58 = vpop.f32.mrb[44].mxu1 }
 0x14f   :  { %v1621_v30 = vmax.f32 %v1617_v35, %v1609_v45  ;;  %v1727_v43 = vmul.f32 %v4807_v50, %v1609_v45  ;;  %v1956_v21 = vmax.f32 %v1952_v7, %v1944_v60  ;;  %v4957_v36 = vmax.f32 %v966_v57, %v1300_v20  ;;  %5375 = vst [vmem:[#allocation15_spill] sm:$0xff] %v4964_v58  ;;  %v1584_v50 = vpop.f32.mrb[45].mxu0  ;;  %v4970_v7 = vpop.f32.mrb[45].mxu1 }
 0x150   :  { %v1616_v63 = vmax.f32 %v5371_v39, %v1604_v34  ;;  %v1951_v33 = vmax.f32 %v5373_v44, %v1939_v6  ;;  %v1737_v4 = vadd.f32 %v1736_v10, %v1722_v61  ;;  %v4960_v41 = vmul.f32 %v4910_v51, %v1944_v60 }
 0x151   :  { %v1619_v62 = vmax.f32 %v1615_v28, %v1607_v37  ;;  %v2072_v54 = vadd.f32 %v2071_v46, %v2057_v3  ;;  %v1725_v34 = vmul.f32 %v4657_v24, %v1607_v37  ;;  %v4967_v39 = vmax.f32 %v1950_v0, %v1942_v55  ;;  %v4978_v46 = vpop.permute.xlu1 %2359  ;;  %v2030_v24 = vpop.permute.xlu0 %2029 }
 0x152   :  { %v2060_v35 = vmul.f32 %v4748_v23, %v1942_v55  ;;  %v1738_v10 = vadd.f32 %v1737_v4, %v4918_v16  ;;  %v5376_v51 = vmax.f32 %v4795_v25, 0.0  ;;  %v412_v28 = vrot.slane %v4752_v47, 1  ;;  %v4982_v55 = vpop.f32.mrb[46].mxu0  ;;  %v4984_v16 = vpop.f32.mrb[46].mxu1 }
 0x153   :  { %v5377_v6 = vmax.f32 %v4646_v9, 0.0  ;;  %v2073_v37 = vadd.f32 %v2072_v54, %v4925_v40  ;;  %v1610_v0 = vmax.f32 %v3491_v38, 0.0  ;;  %v1945_v23 = vmax.f32 %v4943_v8, 0.0  ;;  %5378 = vst [vmem:[#allocation26_spill] sm:$0xff] %v4982_v55  ;;  %5379 = vst [vmem:[#allocation6_spill] sm:$0xff] %v4984_v16  ;;  %v4993_v27 = vpop.f32.mrb[47].mxu1 }
 0x154   :  { %v1061_v20 = vmul.f32 %v1040_v11, %v5376_v51  ;;  %v1608_v60 = vmax.f32 %v1571_v53, 0.0  ;;  %v1739_v25 = vadd.f32 %v1738_v10, %v1724_v1  ;;  %v4988_v57 = vadd.f32 %v412_v28, %v4752_v47 }
 0x155   :  { %v727_v45 = vmul.f32 %v710_v42, %v5377_v6  ;;  %v4991_v42 = vpop.f32.mrb[47].mxu0  ;;  %v2074_v40 = vadd.f32 %v2073_v37, %v2059_v13  ;;  %v1622_v38 = vmax.f32 %v1618_v14, %v1610_v0  ;;  %v4996_v8 = vmul.f32 %v4912_v52, %v1610_v0  ;;  %v1045_v56 = vpop.permute.xlu1 %1044 }
 0x156   :  { %v1076_v11 = vadd.f32 %v4922_v32, %v1061_v20  ;;  %v1957_v53 = vmax.f32 %v1953_v49, %v1945_v23  ;;  %v1740_v61 = vadd.f32 %v1739_v25, %v1725_v34  ;;  %v1620_v1 = vmax.f32 %v1616_v63, %v1608_v60  ;;  %v4999_v47 = vpop.permute.xlu0 %2689  ;;  %v5006_v10 = vpop.f32.mrb[48].mxu0 }
 0x157   :  { %v742_v9 = vadd.f32 %v4893_v26, %v727_v45  ;;  %v1726_v32 = vmul.f32 %v4750_v15, %v1608_v60  ;;  %5380 = vst [vmem:[#allocation12_spill] sm:$0xff] %v4999_v47  ;;  %v2075_v3 = vadd.f32 %v2074_v40, %v2060_v35  ;;  %v1943_v26 = vmax.f32 %v4945_v12, 0.0  ;;  %v5008_v63 = vpop.f32.mrb[48].mxu1  ;;  %v5016_v12 = vpop.f32.mrb[49].mxu0 }
 0x158   :  { %v5381_v4 = vmax.f32 %v4823_v18, 0.0  ;;  %v5289_v14 = vmax.f32 %v4962_v19, 0.0  ;;  %v5288_v49 = vmax.f32 %v4964_v58, 0.0  ;;  %v1611_v34 = vmax.f32 %v1584_v50, 0.0  ;;  %v5024_v60 = vpop.f32.mrb[50].mxu0 }
 0x159   :  { %v743_v44 = vrot.slane %v742_v9, 4  ;;  %v1741_v52 = vadd.f32 %v1740_v61, %v1726_v32  ;;  %v1955_v15 = vmax.f32 %v1951_v33, %v1943_v26  ;;  %v2061_v51 = vmul.f32 %v4832_v5, %v1943_v26  ;;  %v1705_v45 = vpop.permute.xlu1 %1704 }
 0x15a   :  { %v1395_v54 = vmul.f32 %v1370_v22, %v5381_v4  ;;  %v1625_v18 = vmax.f32 %v1621_v30, %v5289_v14  ;;  %v5018_v22 = vpop.f32.mrb[49].mxu1  ;;  %v1960_v50 = vmax.f32 %v1956_v21, %v5288_v49  ;;  %v1623_v6 = vmax.f32 %v1619_v62, %v1611_v34  ;;  %v1375_v33 = vpop.permute.xlu0 %1374 }
 0x15b   :  { %v744_v13 = vadd.f32 %v743_v44, %v742_v9  ;;  %v1742_v28 = vadd.f32 %v1741_v52, %v1727_v43  ;;  %v2076_v37 = vadd.f32 %v2075_v3, %v2061_v51  ;;  %v1729_v5 = vmul.f32 %v4953_v31, %v1611_v34  ;;  %v5026_v30 = vpop.f32.mrb[50].mxu1  ;;  %v5031_v62 = vpop.f32.mrb[51].mxu0 }
 0x15c   :  { %v5012_v35 = vadd.f32 %v4914_v2, %v1395_v54  ;;  %v1946_v2 = vmax.f32 %v4970_v7, 0.0  ;;  %v2063_v0 = vmul.f32 %v2030_v24, %v1945_v23  ;;  %v5287_v9 = vmax.f32 %v4982_v55, 0.0  ;;  %v5033_v40 = vpop.f32.mrb[51].mxu1  ;;  %v5392_v7 = vld [vmem:[#allocation18_spill] sm:$0xff] }
 0x15d   :  { %v745_v20 = vrot.slane %v744_v13, 2  ;;  %v5286_v43 = vmax.f32 %v4984_v16, 0.0  ;;  %v1612_v21 = vmax.f32 %v4991_v42, 0.0  ;;  %v2077_v24 = vadd.f32 %v2076_v37, %v4960_v41  ;;  %v5046_v4 = vpop.permute.xlu1 %2364  ;;  %v5383_v37 = vld [vmem:[#allocation16_spill] sm:$0xff]  ;;  %v5396_v55 = vld [vmem:[#allocation10_spill] sm:$0xff] }
 0x15e   :  { %v1958_v31 = vmax.f32 %v4967_v39, %v1946_v2  ;;  %v5290_v23 = vmax.f32 %v4993_v27, 0.0  ;;  %v5382_v61 = vmax.f32 %v4815_v59, 0.0  ;;  %v1626_v3 = vmax.f32 %v1622_v38, %v5287_v9  ;;  %v2035_v54 = vpop.permute.xlu0 %2034  ;;  %v5053_v38 = vpop.f32.mrb[52].mxu0 }
 0x15f   :  { %v746_v25 = vadd.f32 %v745_v20, %v744_v13  ;;  %v1961_v42 = vmax.f32 %v1957_v53, %v5286_v43  ;;  %v1624_v26 = vmax.f32 %v1620_v1, %v1612_v21  ;;  %v5048_v13 = vadd.f32 %v2077_v24, %v2063_v0  ;;  %v5055_v20 = vpop.f32.mrb[52].mxu1 }
 0x160   :  { %v1062_v44 = vmul.f32 %v1045_v56, %v5382_v61  ;;  %v1959_v41 = vmax.f32 %v1955_v15, %v5290_v23  ;;  %v5294_v59 = vmax.f32 %v5006_v10, 0.0  ;;  %v1628_v52 = vmax.f32 %v1625_v18, %v1626_v3  ;;  %v5061_v15 = vpop.f32.mrb[53].mxu0  ;;  %v5384_v3 = vld [vmem:[#allocation24_spill] sm:$0xff] }
 0x161   :  { %v747_v32 = vrot.slane %v746_v25, 1  ;;  %v1963_v34 = vmax.f32 %v1960_v50, %v1961_v42  ;;  %v1627_v51 = vmax.f32 %v1623_v6, %v1624_v26  ;;  %v5293_v24 = vmax.f32 %v5008_v63, 0.0 }
 0x162   :  { %v1077_v39 = vadd.f32 %v1076_v11, %v1062_v44  ;;  %v1962_v53 = vmax.f32 %v1958_v31, %v1959_v41  ;;  %v2389_v0 = vmul.f32 %v5383_v37, %v5294_v59  ;;  %v5063_v11 = vpop.f32.mrb[53].mxu1  ;;  %v5292_v6 = vmax.f32 %v5016_v12, 0.0  ;;  %v5070_v31 = vpop.permute.xlu1 %1379  ;;  %v5386_v37 = vld [vmem:[#allocation19_spill] sm:$0xff] }
 0x163   :  { %v748_v56 = vadd.f32 %v747_v32, %v746_v25  ;;  %v1629_v50 = vmax.f32 %v1627_v51, %v1628_v52  ;;  %v5291_v25 = vmax.f32 %v5018_v22, 0.0  ;;  %v5072_v61 = vpop.permute.xlu0 %2694  ;;  %v5077_v42 = vmul.f32 %v5384_v3, %v5293_v24  ;;  %v5079_v41 = vpop.f32.mrb[54].mxu0  ;;  %v5385_v52 = vld [vmem:[#allocation11_spill] sm:$0xff] }
 0x164   :  { %v1078_v1 = vrot.slane %v1077_v39, 4  ;;  %v1964_v44 = vmax.f32 %v1962_v53, %v1963_v34  ;;  %v1730_v26 = vmul.f32 %v1705_v45, %v1612_v21  ;;  %v2387_v51 = vmul.f32 %v5385_v52, %v5292_v6  ;;  %v5090_v53 = vpop.f32.mrb[55].mxu0 }
 0x165   :  { %v5066_v18 = vadd.f32 %v748_v56, %v4988_v57  ;;  %v5081_v57 = vpop.f32.mrb[54].mxu1  ;;  %v1630_v56 = vrot.slane %v1629_v50, 4  ;;  %v2722_v34 = vmul.f32 %v5386_v37, %v5291_v25  ;;  %v5387_v3 = vmax.f32 %v4797_v48, 0.0  ;;  %v5388_v48 = vld [vmem:[#allocation25_spill] sm:$0xff] }
 0x166   :  { %v1079_v32 = vadd.f32 %v1078_v1, %v1077_v39  ;;  %v1743_v39 = vadd.f32 %v1742_v28, %v4996_v8  ;;  %v5092_v1 = vpop.f32.mrb[55].mxu1  ;;  %v1965_v45 = vrot.slane %v1964_v44, 4  ;;  %v5297_v9 = vmax.f32 %v5024_v60, 0.0  ;;  %v5099_v37 = vpop.permute.xlu1 %2039 }
 0x167   :  { %v1396_v43 = vmul.f32 %v1375_v33, %v5387_v3  ;;  %v1631_v49 = vmax.f32 %v1629_v50, %v1630_v56  ;;  %v5296_v52 = vmax.f32 %v5026_v30, 0.0  ;;  %v5295_v23 = vmax.f32 %v5031_v62, 0.0  ;;  %v5101_v8 = vpop.permute.xlu0 %1709  ;;  %v5390_v56 = vld [vmem:[#allocation13_spill] sm:$0xff]  ;;  %v5115_v59 = vpop.f32.mrb[56].mxu0 }
 0x168   :  { %v1080_v21 = vrot.slane %v1079_v32, 2  ;;  %v1744_v14 = vadd.f32 %v1743_v39, %v1729_v5  ;;  %v1966_v28 = vmax.f32 %v1964_v44, %v1965_v45  ;;  %v2390_v33 = vmul.f32 %v5388_v48, %v5297_v9  ;;  %v5389_v5 = vld [vmem:[#allocation31_spill] sm:$0xff]  ;;  %v5117_v44 = vpop.f32.mrb[56].mxu1 }
 0x169   :  { %v1411_v6 = vadd.f32 %v5012_v35, %v1396_v43  ;;  %v1632_v3 = vrot.slane %v1631_v49, 2  ;;  %v2725_v50 = vmul.f32 %v5389_v5, %v5296_v52  ;;  %v2388_v39 = vmul.f32 %v5390_v56, %v5295_v23  ;;  %v5124_v45 = vpop.f32.mrb[57].mxu1 }
 0x16a   :  { %v1081_v25 = vadd.f32 %v1080_v21, %v1079_v32  ;;  %v5107_v24 = vadd.f32 %v1744_v14, %v1730_v26  ;;  %v1967_v35 = vrot.slane %v1966_v28, 2  ;;  %v5299_v32 = vmax.f32 %v5033_v40, 0.0  ;;  %v5122_v26 = vpop.f32.mrb[57].mxu0  ;;  %v5128_v23 = vpop.permute.xlu1 %2699 }
 0x16b   :  { %v2064_v14 = vmul.f32 %v2035_v54, %v1946_v2  ;;  %v1633_v21 = vmax.f32 %v1631_v49, %v1632_v3  ;;  %v2403_v48 = vadd.f32 %v2388_v39, %v2387_v51  ;;  %v2275_v5 = vmax.f32 %v5053_v38, 0.0  ;;  %v5130_v52 = vpop.permute.xlu0 %2369  ;;  %v5136_v47 = vpop.f32.mrb[58].mxu0 }
 0x16c   :  { %v1082_v43 = vrot.slane %v1081_v25, 1  ;;  %v2610_v56 = vmax.f32 %v5055_v20, 0.0  ;;  %5391 = vst [vmem:[#allocation3_spill] sm:$0xff] %v5130_v52  ;;  %v1968_v9 = vmax.f32 %v1966_v28, %v1967_v35  ;;  %v2723_v2 = vmul.f32 %v5392_v7, %v5299_v32  ;;  %v5138_v49 = vpop.f32.mrb[58].mxu1  ;;  %v5145_v28 = vpop.f32.mrb[59].mxu0 }
 0x16d   :  { %v2079_v54 = vadd.f32 %v5048_v13, %v2064_v14  ;;  %v1634_v51 = vrot.slane %v1633_v21, 1  ;;  %v2404_v38 = vadd.f32 %v2403_v48, %v2389_v0  ;;  %v5393_v20 = vmax.f32 %v5006_v10, 0.0  ;;  %v5395_v48 = vld [vmem:[#allocation20_spill] sm:$0xff] }
 0x16e   :  { %v1083_v16 = vadd.f32 %v1082_v43, %v1081_v25  ;;  %v5143_v39 = vmul.f32 %v4679_v17, %v2275_v5  ;;  %v5147_v25 = vpop.f32.mrb[59].mxu1  ;;  %v1969_v35 = vrot.slane %v1968_v9, 1  ;;  %v2738_v13 = vadd.f32 %v2723_v2, %v2722_v34 }
 0x16f   :  { %v2287_v3 = vmax.f32 %v5393_v20, %v2275_v5  ;;  %v5394_v14 = vmax.f32 %v5008_v63, 0.0  ;;  %v1635_v0 = vmax.f32 %v1633_v21, %v1634_v51  ;;  %v2728_v10 = vmul.f32 %v5395_v48, %v2610_v56  ;;  %v2045_v48 = vpop.permute.xlu1 %2044 }
 0x170   :  { %v5150_v43 = vadd.f32 %v1083_v16, %v5066_v18  ;;  %v2273_v20 = vmax.f32 %v5061_v15, 0.0  ;;  %v2405_v17 = vadd.f32 %v2404_v38, %v2390_v33  ;;  %v1970_v5 = vmax.f32 %v1968_v9, %v1969_v35  ;;  %v5163_v18 = vpop.permute.xlu0 %1714  ;;  %v5170_v9 = vpop.f32.mrb[60].mxu0  ;;  %v5401_v33 = vld [vmem:[#allocation32_spill] sm:$0xff] }
 0x171   :  { %v5154_v7 = vmax.f32 %v5394_v14, %v2610_v56  ;;  %v2739_v32 = vadd.f32 %v2738_v13, %v5077_v42  ;;  %v2608_v52 = vmax.f32 %v5063_v11, 0.0  ;;  %v5397_v58 = vmax.f32 %v5396_v55, 0.0  ;;  %v5399_v56 = vld [vmem:[#allocation29_spill] sm:$0xff]  ;;  %v5172_v42 = vpop.f32.mrb[60].mxu1  ;;  %v5177_v38 = vpop.f32.mrb[61].mxu0  ;;  %v5403_v14 = vld [vmem:[#allocation4_spill] sm:$0xff] }
 0x172   :  { %v1636_v63 = vmax.f32 %v4957_v36, %v1635_v0  ;;  %v5398_v34 = vmax.f32 %v5016_v12, 0.0  ;;  %v2391_v2 = vmul.f32 %v5399_v56, %v2273_v20  ;;  %v2276_v15 = vmax.f32 %v5079_v41, 0.0  ;;  %v5179_v36 = vpop.f32.mrb[61].mxu1 }
 0x173   :  { %v1397_v16 = vmul.f32 %v5070_v31, %v5397_v58  ;;  %v5400_v11 = vmax.f32 %v5018_v22, 0.0  ;;  %v2726_v58 = vmul.f32 %v5401_v33, %v2608_v52  ;;  %v2740_v31 = vadd.f32 %v2739_v32, %v2725_v50  ;;  %v5190_v50 = vpop.f32.mrb[62].mxu1 }
 0x174   :  { %v2285_v21 = vmax.f32 %v5398_v34, %v2273_v20  ;;  %v5181_v12 = vmax.f32 %v1636_v63, %v1970_v5  ;;  %v2406_v35 = vadd.f32 %v2405_v17, %v2391_v2  ;;  %v5402_v41 = vmax.f32 %v5024_v60, 0.0 }
 0x175   :  { %v2620_v55 = vmax.f32 %v5400_v11, %v2608_v52  ;;  %v1412_v51 = vadd.f32 %v1411_v6, %v1397_v16  ;;  %v2394_v0 = vmul.f32 %v5403_v14, %v2276_v15  ;;  %v2741_v20 = vadd.f32 %v2740_v31, %v2726_v58  ;;  %v5188_v6 = vpop.f32.mrb[62].mxu0  ;;  %v5407_v11 = vld [vmem:[#allocation28_spill] sm:$0xff]  ;;  %v5411_v31 = vld [vmem:[#allocation34_spill] sm:$0xff] }
 0x176   :  { %v2288_v13 = vmax.f32 %v5402_v41, %v2276_v15  ;;  %v2611_v34 = vmax.f32 %v5081_v57, 0.0  ;;  %v2274_v52 = vmax.f32 %v5090_v53, 0.0  ;;  %v2609_v32 = vmax.f32 %v5092_v1, 0.0  ;;  %v5200_v56 = vpop.f32.mrb[63].mxu0  ;;  %v5202_v57 = vpop.f32.mrb[63].mxu1 }
 0x177   :  { %v1413_v22 = vrot.slane %v1412_v51, 4  ;;  %v5404_v17 = vmax.f32 %v4993_v27, 0.0  ;;  %v5405_v5 = vmax.f32 %v4962_v19, 0.0  ;;  %v2279_v63 = vmax.f32 %v5115_v59, 0.0 }
 0x178   :  { %v5406_v2 = vmax.f32 %v5026_v30, 0.0  ;;  %v2729_v1 = vmul.f32 %v5407_v11, %v2611_v34  ;;  %v5408_v27 = vmax.f32 %v5031_v62, 0.0  ;;  %v5410_v19 = vmax.f32 %v5033_v40, 0.0 }
 0x179   :  { %v2065_v60 = vmul.f32 %v5099_v37, %v5404_v17  ;;  %v1731_v16 = vmul.f32 %v5101_v8, %v5405_v5  ;;  %v1414_v53 = vadd.f32 %v1413_v22, %v1412_v51  ;;  %v5409_v37 = vld [vmem:[#allocation33_spill] sm:$0xff]  ;;  %v2727_v59 = vmul.f32 %v5411_v31, %v2609_v32  ;;  %v5215_v22 = vpop.permute.xlu0 %2374 }
 0x17a   :  { %v2623_v15 = vmax.f32 %v5406_v2, %v2611_v34  ;;  %v2286_v33 = vmax.f32 %v5408_v27, %v2274_v52  ;;  %v2392_v58 = vmul.f32 %v5409_v37, %v2274_v52  ;;  %v2621_v8 = vmax.f32 %v5410_v19, %v2609_v32 }
 0x17b   :  { %v2080_v41 = vadd.f32 %v2079_v54, %v2065_v60  ;;  %v1415_v14 = vrot.slane %v1414_v53, 2  ;;  %v1746_v17 = vadd.f32 %v5107_v24, %v1731_v16  ;;  %v2291_v51 = vmax.f32 %v2287_v3, %v2279_v63  ;;  %v2705_v60 = vpop.permute.xlu1 %2704 }
 0x17c   :  { %v2397_v30 = vmul.f32 %v4978_v46, %v2279_v63  ;;  %v2407_v34 = vadd.f32 %v2406_v35, %v2392_v58  ;;  %v2742_v5 = vadd.f32 %v2741_v20, %v2727_v59  ;;  %v2614_v62 = vmax.f32 %v5117_v44, 0.0  ;;  %v5412_v44 = vld [vmem:[#allocation21_spill] sm:$0xff]  ;;  %v5417_v59 = vld [vmem:[#allocation7_spill] sm:$0xff] }
 0x17d   :  { %v2277_v52 = vmax.f32 %v5122_v26, 0.0  ;;  %v1416_v2 = vadd.f32 %v1415_v14, %v1414_v53  ;;  %v2612_v40 = vmax.f32 %v5124_v45, 0.0  ;;  %v2280_v32 = vmax.f32 %v5136_v47, 0.0 }
 0x17e   :  { %v2615_v54 = vmax.f32 %v5138_v49, 0.0  ;;  %v2408_v24 = vadd.f32 %v2407_v34, %v5143_v39  ;;  %v2743_v3 = vadd.f32 %v2742_v5, %v2728_v10  ;;  %v2626_v46 = vmax.f32 %v5154_v7, %v2614_v62  ;;  %v2050_v10 = vpop.permute.xlu0 %2049 }
 0x17f   :  { %v2732_v35 = vmul.f32 %v5072_v61, %v2614_v62  ;;  %v1417_v20 = vrot.slane %v1416_v2, 1  ;;  %v2289_v16 = vmax.f32 %v2285_v21, %v2277_v52  ;;  %v2395_v63 = vmul.f32 %v5412_v44, %v2277_v52 }
 0x180   :  { %v2624_v26 = vmax.f32 %v2620_v55, %v2612_v40  ;;  %v2409_v53 = vadd.f32 %v2408_v24, %v2394_v0  ;;  %v2730_v45 = vmul.f32 %v4927_v29, %v2612_v40  ;;  %v2744_v11 = vadd.f32 %v2743_v3, %v2729_v1  ;;  %v5413_v0 = vld [vmem:[#allocation15_spill] sm:$0xff] }
 0x181   :  { %v2292_v47 = vmax.f32 %v2288_v13, %v2280_v32  ;;  %v1418_v27 = vadd.f32 %v1417_v20, %v1416_v2  ;;  %v2398_v49 = vmul.f32 %v5046_v4, %v2280_v32  ;;  %v2627_v37 = vmax.f32 %v2623_v15, %v2615_v54  ;;  %v5415_v13 = vld [vmem:[#allocation26_spill] sm:$0xff] }
 0x182   :  { %v2733_v39 = vmul.f32 %v5128_v23, %v2615_v54  ;;  %v2410_v7 = vadd.f32 %v2409_v53, %v2395_v63  ;;  %v2745_v58 = vadd.f32 %v2744_v11, %v2730_v45  ;;  %v2278_v61 = vmax.f32 %v5145_v28, 0.0  ;;  %v2380_v23 = vpop.permute.xlu1 %2379  ;;  %v5418_v28 = vld [vmem:[#allocation12_spill] sm:$0xff] }
 0x183   :  { %v2613_v21 = vmax.f32 %v5147_v25, 0.0  ;;  %v5232_v55 = vadd.f32 %v1418_v27, %v5150_v43  ;;  %v5414_v29 = vmax.f32 %v5413_v0, 0.0  ;;  %v5416_v19 = vmax.f32 %v5415_v13, 0.0 }
 0x184   :  { %v2283_v15 = vmax.f32 %v5170_v9, 0.0  ;;  %v2290_v31 = vmax.f32 %v2286_v33, %v2278_v61  ;;  %v2396_v14 = vmul.f32 %v5417_v59, %v2278_v61  ;;  %v2618_v52 = vmax.f32 %v5172_v42, 0.0 }
 0x185   :  { %v2066_v1 = vmul.f32 %v2045_v48, %v5414_v29  ;;  %v1732_v4 = vmul.f32 %v5163_v18, %v5416_v19  ;;  %v2625_v34 = vmax.f32 %v2621_v8, %v2613_v21  ;;  %v2731_v5 = vmul.f32 %v5418_v28, %v2613_v21  ;;  %v2710_v8 = vpop.permute.xlu0 %2709 }
 0x186   :  { %v2295_v43 = vmax.f32 %v2291_v51, %v2283_v15  ;;  %v2411_v2 = vadd.f32 %v2410_v7, %v2396_v14  ;;  %v2281_v40 = vmax.f32 %v5177_v38, 0.0  ;;  %v2616_v18 = vmax.f32 %v5179_v36, 0.0  ;;  %v2385_v53 = vpop.permute.xlu1 %2384 }
 0x187   :  { %v2081_v25 = vadd.f32 %v2080_v41, %v2066_v1  ;;  %v1747_v62 = vadd.f32 %v1746_v17, %v1732_v4  ;;  %v2746_v48 = vadd.f32 %v2745_v58, %v2731_v5  ;;  %v2630_v9 = vmax.f32 %v2626_v46, %v2618_v52  ;;  %v5419_v41 = vld [vmem:[#allocation3_spill] sm:$0xff] }
 0x188   :  { %v2284_v33 = vmax.f32 %v5188_v6, 0.0  ;;  %v2619_v54 = vmax.f32 %v5190_v50, 0.0  ;;  %v2412_v24 = vadd.f32 %v2411_v2, %v2397_v30  ;;  %v2293_v3 = vmax.f32 %v2289_v16, %v2281_v40 }
 0x189   :  { %v1748_v32 = vrot.slane %v1747_v62, 4  ;;  %v2399_v17 = vmul.f32 %v5419_v41, %v2281_v40  ;;  %v2628_v51 = vmax.f32 %v2624_v26, %v2616_v18  ;;  %v2734_v42 = vmul.f32 %v2705_v60, %v2616_v18 }
 0x18a   :  { %v2747_v44 = vadd.f32 %v2746_v48, %v2732_v35  ;;  %v2296_v63 = vmax.f32 %v2292_v47, %v2284_v33  ;;  %v2413_v38 = vadd.f32 %v2412_v24, %v2398_v49  ;;  %v2631_v45 = vmax.f32 %v2627_v37, %v2619_v54  ;;  %v5420_v47 = vld [vmem:[#allocation6_spill] sm:$0xff]  ;;  %v2715_v37 = vpop.permute.xlu0 %2714  ;;  %v2720_v13 = vpop.permute.xlu1 %2719 }
 0x18b   :  { %v1749_v20 = vadd.f32 %v1748_v32, %v1747_v62  ;;  %v2282_v36 = vmax.f32 %v5200_v56, 0.0  ;;  %v2617_v46 = vmax.f32 %v5202_v57, 0.0  ;;  %v2401_v27 = vmul.f32 %v2380_v23, %v2283_v15 }
 0x18c   :  { %v2748_v11 = vadd.f32 %v2747_v44, %v2733_v39  ;;  %v2298_v50 = vmax.f32 %v2295_v43, %v2296_v63  ;;  %v2414_v30 = vadd.f32 %v2413_v38, %v2399_v17  ;;  %v2633_v16 = vmax.f32 %v2630_v9, %v2631_v45 }
 0x18d   :  { %v1750_v6 = vrot.slane %v1749_v20, 2  ;;  %v2294_v7 = vmax.f32 %v2290_v31, %v2282_v36  ;;  %v2400_v26 = vmul.f32 %v5215_v22, %v2282_v36  ;;  %v2629_v35 = vmax.f32 %v2625_v34, %v2617_v46 }
 0x18e   :  { %v2749_v60 = vadd.f32 %v2748_v11, %v2734_v42  ;;  %v5421_v61 = vmax.f32 %v5420_v47, 0.0  ;;  %v2402_v0 = vmul.f32 %v2385_v53, %v2284_v33  ;;  %v2735_v57 = vmul.f32 %v2710_v8, %v2617_v46 }
 0x18f   :  { %v1751_v58 = vadd.f32 %v1750_v6, %v1749_v20  ;;  %v2297_v21 = vmax.f32 %v2293_v3, %v2294_v7  ;;  %v2415_v56 = vadd.f32 %v2414_v30, %v2400_v26  ;;  %v2632_v39 = vmax.f32 %v2628_v51, %v2629_v35 }
 0x190   :  { %v2067_v49 = vmul.f32 %v2050_v10, %v5421_v61  ;;  %v2750_v15 = vadd.f32 %v2749_v60, %v2735_v57  ;;  %v2736_v23 = vmul.f32 %v2715_v37, %v2618_v52  ;;  %v2737_v28 = vmul.f32 %v2720_v13, %v2619_v54 }
 0x191   :  { %v1752_v29 = vrot.slane %v1751_v58, 1  ;;  %v2299_v19 = vmax.f32 %v2297_v21, %v2298_v50  ;;  %v2416_v4 = vadd.f32 %v2415_v56, %v2401_v27  ;;  %v2634_v31 = vmax.f32 %v2632_v39, %v2633_v16 }
 0x192   :  { %v2082_v1 = vadd.f32 %v2081_v25, %v2067_v49  ;;  %v2751_v10 = vadd.f32 %v2750_v15, %v2736_v23  ;;  %v5422_v5 = vmov 0.0   ;;  %v2760_v20 = vlaneseq }
 0x193   :  { %v1753_v22 = vadd.f32 %v1752_v29, %v1751_v58  ;;  %v2300_v14 = vrot.slane %v2299_v19, 4  ;;  %v2417_v34 = vadd.f32 %v2416_v4, %v2402_v0  ;;  %3608 = vmatprep.mubr.msk.bf16.mxu0 %vm3705_vm0, %v5422_v5  ;;  %v2635_v43 = vrot.slane %v2634_v31, 4 }
 0x194   :  { %v2083_v59 = vrot.slane %v2082_v1, 4  ;;  %v2752_v40 = vadd.f32 %v2751_v10, %v2737_v28  ;;  %v2761_v6 = vand.u32 127, %v2760_v20 }
 0x195   :  { %v1754_v62 = vadd.f32 %v1753_v22, %v5232_v55  ;;  %v2301_v25 = vmax.f32 %v2299_v19, %v2300_v14  ;;  %v2418_v48 = vrot.slane %v2417_v34, 4  ;;  %v2636_v18 = vmax.f32 %v2634_v31, %v2635_v43 }
 0x196   :  { %v2084_v2 = vadd.f32 %v2083_v59, %v2082_v1  ;;  %v2753_v33 = vrot.slane %v2752_v40, 4  ;;  %vm2762_vm1 = vcmp.lt.s32.totalorder %v2761_v6, 8  ;;  %vm2869_vm2 = vcmp.lt.s32.totalorder %v2761_v6, 32 }
 0x197   :  { %v2302_v52 = vrot.slane %v2301_v25, 2  ;;  %v2419_v9 = vadd.f32 %v2418_v48, %v2417_v34  ;;  %v2637_v8 = vrot.slane %v2636_v18, 2  ;;  %vm2886_vm4 = vcmp.eq.s32.totalorder %v2761_v6, 127 }
 0x198   :  { %v2085_v32 = vrot.slane %v2084_v2, 2  ;;  %v2754_v41 = vadd.f32 %v2753_v33, %v2752_v40 }
 0x199   :  { %v2303_v3 = vmax.f32 %v2301_v25, %v2302_v52  ;;  %v2420_v54 = vrot.slane %v2419_v9, 2  ;;  %v2638_v17 = vmax.f32 %v2636_v18, %v2637_v8 }
 0x19a   :  { %v2086_v24 = vadd.f32 %v2085_v32, %v2084_v2  ;;  %v2755_v44 = vrot.slane %v2754_v41, 2 }
 0x19b   :  { %v2304_v42 = vrot.slane %v2303_v3, 1  ;;  %v2421_v55 = vadd.f32 %v2420_v54, %v2419_v9  ;;  %v2639_v63 = vrot.slane %v2638_v17, 1 }
 0x19c   :  { %v2087_v51 = vrot.slane %v2086_v24, 1  ;;  %v2756_v36 = vadd.f32 %v2755_v44, %v2754_v41 }
 0x19d   :  { %v2305_v38 = vmax.f32 %v2303_v3, %v2304_v42  ;;  %v2422_v45 = vrot.slane %v2421_v55, 1  ;;  %v2640_v50 = vmax.f32 %v2638_v17, %v2639_v63 }
 0x19e   :  { %v2088_v53 = vadd.f32 %v2087_v51, %v2086_v24  ;;  %v2757_v30 = vrot.slane %v2756_v36, 1 }
 0x19f   :  { %v2306_v11 = vmax.f32 %v5181_v12, %v2305_v38  ;;  %v2423_v27 = vadd.f32 %v2422_v45, %v2421_v55 }
 0x1a0   :  { %v2089_v46 = vadd.f32 %v2088_v53, %v1754_v62  ;;  %v2758_v26 = vadd.f32 %v2757_v30, %v2756_v36 }
 0x1a1   :  { %v2641_v16 = vmax.f32 %v2306_v11, %v2640_v50 }
 0x1a2   :  { %v2424_v7 = vadd.f32 %v2423_v27, %v2089_v46 }
 0x1a4   :  { %v2759_v58 = vadd.f32 %v2758_v26, %v2424_v7 }
 0x1a6   :  { %v2763_v60 = vsel %vm2762_vm1, %v2641_v16, %v2759_v58 }
 0x1a7   :  { %v2764_v35 = vpack.c.bf16 %v2763_v60, %v2763_v60 }
 0x1a9   :  { %3609 = vmatmul.mubr.bf16.vlgmr.msra.gmra.mrb[64].mxu0 %v2764_v35 }
 0x27c   :  { %v2863_v47 = vpop.f32.mrb[64].mxu0 }
 0x27d   :  { %v2870_v61 = vsel %vm2869_vm2, %v2863_v47, 0.0  ;;  %v3610_v49 = vpop.f32.mrb[65].mxu0  ;;  %v2879_v0 = vadd.f32 3.0, %v2863_v47 }
 0x27e   :  { %v2871_v37 = vmul.f32 %v2870_v61, %v2870_v61  ;;  %v2866_v21 = vpop.f32.mrb[66].mxu0 }
 0x27f   :  { %v3611_v56 = vpop.f32.mrb[67].mxu0  ;;  %v3198_v57 = vmul.f32 -1.442695, %v2879_v0 }
 0x280   :  { %v2873_v12 = vsel %vm2872_vm3, %v2871_v37, 0.0 }
 0x281   :  { %2874 = vadd.xlane.f32.xlu0 %v2873_v12  ;;  %3697 = vpow2.f32 %v3198_v57 }
 0x28b   :  { %v3698_v29 = vpop.eup %3697 }
 0x28c   :  { %v2883_v39 = vadd.f32 1.0, %v3698_v29 }
 0x28e   :  { %3699 = vrcp.f32 %v2883_v39 }
 0x298   :  { %v3700_v19 = vpop.eup %3699 }
 0x299   :  { %v2887_v23 = vsel %vm2886_vm4, %v3700_v19, 0.0 }
 0x30e   :  { %v2875_v1 = vpop.xlane.xlu0 %2874 }
 0x30f   :  { %v2876_v13 = vmax.f32 %v2875_v1, 1e-24 }
 0x311   :  { %3701 = vrsqrt.f32 %v2876_v13 }
 0x31b   :  { %v3702_v4 = vpop.eup %3701 }
 0x31c   :  { %v2878_v15 = vmul.f32 %v3702_v4, %v2870_v61 }
 0x31e   :  { %v2888_v22 = vadd.f32 %v2887_v23, %v2878_v15 }
 0x320   :  { %2889 = vst [vmem:[%s5263_s4] sm:$0x1] %v2888_v22 }

</bundles_post_ra>
